<compile_context>
chip_gen: v5e
topology: v5e:2x2
jax: 0.10.0
libtpu: 0.0.40
codegen_flags: <defaults>
</compile_context>

<pallas_src>
import math
import jax
import jax.numpy as jnp
from jax.experimental import pallas as pl
from jax.experimental.pallas import tpu as pltpu


# ---------------------------------------------------------------------------
# Config (small, consistent with the module: dim divisible by num_heads)
# ---------------------------------------------------------------------------
B = 2          # batch
T = 8          # sequence length
DIM = 32       # model dim
HEADS = 4      # num_heads
HEAD_DIM = DIM // HEADS
SCALE = HEAD_DIM ** (-0.5)
TEMPERATURE = 1.0
LN_EPS = 1e-5


# ---------------------------------------------------------------------------
# Kernel: the whole cross-attention block in one shot.
#   x_ref, y_ref : (B*T, DIM)            activations (flattened)
#   wqkv_ref     : (3, HEADS, DIM, hd)   pre-transposed, per-head Q/K/V weights
#   bqkv_ref     : (3, HEADS, 1, hd)     per-head Q/K/V biases (Q pre-scaled)
#   wp_ref       : (HEADS, hd, DIM)      per-head output-projection weight blocks
#   vec_ref      : (5, DIM)              [ln1_w, ln1_b, ln2_w, ln2_b, proj_b]
# ---------------------------------------------------------------------------
def cross_modal_kernel(x_ref, y_ref, wqkv_ref, bqkv_ref, wp_ref, vec_ref, o_ref):
    x = x_ref[...]                       # (B*T, DIM)  -- residual shortcut
    y = y_ref[...]

    ln1w = vec_ref[0:1, :]
    ln1b = vec_ref[1:2, :]
    ln2w = vec_ref[2:3, :]
    ln2b = vec_ref[3:4, :]
    bp = vec_ref[4:5, :]

    # ---- pre LayerNorm on the flattened slab ----
    mu = jnp.mean(x, axis=-1, keepdims=True)
    var = jnp.mean((x - mu) ** 2, axis=-1, keepdims=True)
    xn = (x - mu) * jax.lax.rsqrt(var + LN_EPS) * ln1w + ln1b

    # per-batch accumulators for (attn_out @ Wproj)
    acc = [jnp.zeros((T, DIM), jnp.float32) for _ in range(B)]

    for h in range(HEADS):
        # Per-head projections on the flattened (B*T, DIM) slab.
        # scale / (1/temperature) are already folded into the Q weight & bias.
        qh = jnp.dot(xn, wqkv_ref[0, h],
                     preferred_element_type=jnp.float32) + bqkv_ref[0, h]
        kh = jnp.dot(y, wqkv_ref[1, h],
                     preferred_element_type=jnp.float32) + bqkv_ref[1, h]
        vh = jnp.dot(y, wqkv_ref[2, h],
                     preferred_element_type=jnp.float32) + bqkv_ref[2, h]
        wp_h = wp_ref[h]                 # (hd, DIM)

        for b in range(B):
            lo = b * T                   # sublane-aligned row slice (multiple of 8)
            qb = qh[lo:lo + T, :]        # (T, hd)
            kb = kh[lo:lo + T, :]
            vb = vh[lo:lo + T, :]

            # q @ k^T without materializing a transpose (contract last dims).
            s = jax.lax.dot_general(qb, kb, (((1,), (1,)), ((), ())),
                                    preferred_element_type=jnp.float32)   # (T, T)
            s = s - jnp.max(s, axis=-1, keepdims=True)
            p = jnp.exp(s)
            # Exact reciprocal keeps the 1e-4 check; approx=True would trade
            # ~1e-3 rel error for a free EUP vrcp slot.
            p = p * pl.reciprocal(jnp.sum(p, axis=-1, keepdims=True), approx=False)

            ob = jnp.dot(p, vb, preferred_element_type=jnp.float32)       # (T, hd)
            # block-matmul decomposition of the output projection: no concat.
            acc[b] = acc[b] + jnp.dot(ob, wp_h, preferred_element_type=jnp.float32)

    attn_proj = jnp.concatenate(acc, axis=0)       # (B*T, DIM) -- sublane stack
    xo = attn_proj + bp + x                        # proj bias + residual

    # ---- post LayerNorm ----
    mu2 = jnp.mean(xo, axis=-1, keepdims=True)
    var2 = jnp.mean((xo - mu2) ** 2, axis=-1, keepdims=True)
    out = (xo - mu2) * jax.lax.rsqrt(var2 + LN_EPS) * ln2w + ln2b
    o_ref[...] = out.astype(o_ref.dtype)


# ---------------------------------------------------------------------------
# Host-side parameter packing (one-time, free relative to the kernel):
#   transpose weights, fold scale/temperature into Q, split per head,
#   pack the small vectors into a single buffer.
# ---------------------------------------------------------------------------
def _pack_params(params):
    wq, bq, wkv, bkv, wp, bp, ln1w, ln1b, ln2w, ln2b = params
    qscale = SCALE / TEMPERATURE

    def split_heads(w_t):  # (DIM, DIM) in (in, out) layout -> (HEADS, DIM, hd)
        return w_t.reshape(DIM, HEADS, HEAD_DIM).transpose(1, 0, 2)

    wq_h = split_heads((wq * qscale).T)
    wk_h = split_heads(wkv[:DIM].T)
    wv_h = split_heads(wkv[DIM:].T)
    wqkv = jnp.stack([wq_h, wk_h, wv_h], axis=0)               # (3, H, DIM, hd)

    bq_h = (bq[0] * qscale).reshape(HEADS, 1, HEAD_DIM)
    bk_h = bkv[0, :DIM].reshape(HEADS, 1, HEAD_DIM)
    bv_h = bkv[0, DIM:].reshape(HEADS, 1, HEAD_DIM)
    bqkv = jnp.stack([bq_h, bk_h, bv_h], axis=0)               # (3, H, 1, hd)

    wp_h = wp.T.reshape(HEADS, HEAD_DIM, DIM)                  # (H, hd, DIM)
    vecs = jnp.stack([ln1w[0], ln1b[0], ln2w[0], ln2b[0], bp[0]], axis=0)  # (5, DIM)
    return wqkv, bqkv, wp_h, vecs


def transformer_cross_modal(x, y, params):
    wqkv, bqkv, wp_h, vecs = _pack_params(params)
    x2 = x.reshape(B * T, DIM)
    y2 = y.reshape(B * T, DIM)

    vspec = pl.BlockSpec(memory_space=pltpu.MemorySpace.VMEM)
    out = pl.pallas_call(
        cross_modal_kernel,
        out_shape=jax.ShapeDtypeStruct((B * T, DIM), jnp.float32),
        in_specs=[vspec] * 6,
        out_specs=vspec,
    )(x2, y2, wqkv, bqkv, wp_h, vecs)
    return out.reshape(B, T, DIM)


# ---------------------------------------------------------------------------
# Pure-JAX reference (mirrors the PyTorch forward, dropout in eval mode)
# ---------------------------------------------------------------------------
def reference(x, y, params):
    (wq, bq, wkv, bkv, wp, bp, ln1w, ln1b, ln2w, ln2b) = params

    def ln(t, w, b):
        mu = jnp.mean(t, axis=-1, keepdims=True)
        var = jnp.mean((t - mu) ** 2, axis=-1, keepdims=True)
        return (t - mu) / jnp.sqrt(var + LN_EPS) * w[0] + b[0]

    shortcut = x
    xn = ln(x, ln1w, ln1b)
    q = xn @ wq.T + bq[0]
    kv = y @ wkv.T + bkv[0]
    q = q.reshape(B, T, HEADS, HEAD_DIM).transpose(0, 2, 1, 3)
    kv = kv.reshape(B, T, 2, HEADS, HEAD_DIM).transpose(2, 0, 3, 1, 4)
    k, v = kv[0], kv[1]
    attn = (q * SCALE) @ jnp.swapaxes(k, -2, -1)
    attn = jax.nn.softmax(attn / TEMPERATURE, axis=-1)
    o = (attn @ v).transpose(0, 2, 1, 3).reshape(B, T, DIM)
    o = o @ wp.T + bp[0]
    o = o + shortcut
    return ln(o, ln2w, ln2b)


# ---------------------------------------------------------------------------
# Deterministic parameter init (PyTorch-like uniform ranges)
# ---------------------------------------------------------------------------
def init_params(key):
    keys = jax.random.split(key, 6)
    lim = 1.0 / math.sqrt(DIM)
    wq = jax.random.uniform(keys[0], (DIM, DIM), jnp.float32, -lim, lim)
    bq = jax.random.uniform(keys[1], (1, DIM), jnp.float32, -lim, lim)
    wkv = jax.random.uniform(keys[2], (2 * DIM, DIM), jnp.float32, -lim, lim)
    bkv = jax.random.uniform(keys[3], (1, 2 * DIM), jnp.float32, -lim, lim)
    wp = jax.random.uniform(keys[4], (DIM, DIM), jnp.float32, -lim, lim)
    bp = jax.random.uniform(keys[5], (1, DIM), jnp.float32, -lim, lim)
    ln1w = jnp.ones((1, DIM), jnp.float32)
    ln1b = jnp.zeros((1, DIM), jnp.float32)
    ln2w = jnp.ones((1, DIM), jnp.float32)
    ln2b = jnp.zeros((1, DIM), jnp.float32)
    return (wq, bq, wkv, bkv, wp, bp, ln1w, ln1b, ln2w, ln2b)


if __name__ == "__main__":
    root = jax.random.PRNGKey(0)
    kx, ky, kp = jax.random.split(root, 3)
    x = jax.random.normal(kx, (B, T, DIM), jnp.float32)
    y = jax.random.normal(ky, (B, T, DIM), jnp.float32)
    params = init_params(kp)

    out = transformer_cross_modal(x, y, params)
    out = jax.block_until_ready(out)

    ref = reference(x, y, params)
    assert out.shape == (B, T, DIM)
    assert jnp.allclose(out, ref, atol=1e-4, rtol=1e-4), "mismatch vs reference"

    print("KERNEL_OK")
</pallas_src>

<mosaic_0001>
module attributes {stable_mosaic.version = 11 : i64} {
  func.func @cross_modal_kernel(%arg0: memref<16x32xf32, #tpu.memory_space<vmem>>, %arg1: memref<16x32xf32, #tpu.memory_space<vmem>>, %arg2: memref<3x4x32x8xf32, #tpu.memory_space<vmem>>, %arg3: memref<3x4x1x8xf32, #tpu.memory_space<vmem>>, %arg4: memref<4x8x32xf32, #tpu.memory_space<vmem>>, %arg5: memref<5x32xf32, #tpu.memory_space<vmem>>, %arg6: memref<16x32xf32, #tpu.memory_space<vmem>>) attributes {dimension_semantics = [], scalar_prefetch = 0 : i64, scratch_operands = 0 : i64, tpu.core_type = #tpu.core_type<tc>} {
    %c0 = arith.constant 0 : index
    %c0_0 = arith.constant 0 : index
    %0 = vector.load %arg0[%c0, %c0_0] : memref<16x32xf32, #tpu.memory_space<vmem>>, vector<16x32xf32>
    %c0_1 = arith.constant 0 : index
    %c0_2 = arith.constant 0 : index
    %1 = vector.load %arg1[%c0_1, %c0_2] : memref<16x32xf32, #tpu.memory_space<vmem>>, vector<16x32xf32>
    %c0_3 = arith.constant 0 : index
    %c0_4 = arith.constant 0 : index
    %2 = vector.load %arg5[%c0_3, %c0_4] : memref<5x32xf32, #tpu.memory_space<vmem>>, vector<1x32xf32>
    %c1 = arith.constant 1 : index
    %c0_5 = arith.constant 0 : index
    %3 = vector.load %arg5[%c1, %c0_5] : memref<5x32xf32, #tpu.memory_space<vmem>>, vector<1x32xf32>
    %c2 = arith.constant 2 : index
    %c0_6 = arith.constant 0 : index
    %4 = vector.load %arg5[%c2, %c0_6] : memref<5x32xf32, #tpu.memory_space<vmem>>, vector<1x32xf32>
    %c3 = arith.constant 3 : index
    %c0_7 = arith.constant 0 : index
    %5 = vector.load %arg5[%c3, %c0_7] : memref<5x32xf32, #tpu.memory_space<vmem>>, vector<1x32xf32>
    %c4 = arith.constant 4 : index
    %c0_8 = arith.constant 0 : index
    %6 = vector.load %arg5[%c4, %c0_8] : memref<5x32xf32, #tpu.memory_space<vmem>>, vector<1x32xf32>
    %cst = arith.constant dense<0.000000e+00> : vector<16xf32>
    %7 = vector.multi_reduction <add>, %0, %cst [1] : vector<16x32xf32> to vector<16xf32>
    %8 = vector.shape_cast %7 : vector<16xf32> to vector<16x1xf32>
    %cst_9 = arith.constant 3.200000e+01 : f32
    %9 = vector.broadcast %cst_9 : f32 to vector<16x1xf32>
    %10 = arith.divf %8, %9 : vector<16x1xf32>
    %11 = vector.broadcast %10 : vector<16x1xf32> to vector<16x32xf32>
    %12 = arith.subf %0, %11 : vector<16x32xf32>
    %13 = arith.mulf %12, %12 : vector<16x32xf32>
    %cst_10 = arith.constant dense<0.000000e+00> : vector<16xf32>
    %14 = vector.multi_reduction <add>, %13, %cst_10 [1] : vector<16x32xf32> to vector<16xf32>
    %15 = vector.shape_cast %14 : vector<16xf32> to vector<16x1xf32>
    %cst_11 = arith.constant 3.200000e+01 : f32
    %16 = vector.broadcast %cst_11 : f32 to vector<16x1xf32>
    %17 = arith.divf %15, %16 : vector<16x1xf32>
    %18 = vector.broadcast %10 : vector<16x1xf32> to vector<16x32xf32>
    %19 = arith.subf %0, %18 : vector<16x32xf32>
    %cst_12 = arith.constant 9.99999974E-6 : f32
    %20 = vector.broadcast %cst_12 : f32 to vector<16x1xf32>
    %21 = arith.addf %17, %20 : vector<16x1xf32>
    %22 = math.rsqrt %21 : vector<16x1xf32>
    %23 = vector.broadcast %22 : vector<16x1xf32> to vector<16x32xf32>
    %24 = arith.mulf %19, %23 : vector<16x32xf32>
    %25 = vector.broadcast %2 : vector<1x32xf32> to vector<16x32xf32>
    %26 = arith.mulf %24, %25 : vector<16x32xf32>
    %27 = vector.broadcast %3 : vector<1x32xf32> to vector<16x32xf32>
    %28 = arith.addf %26, %27 : vector<16x32xf32>
    %cst_13 = arith.constant 0.000000e+00 : f32
    %29 = vector.broadcast %cst_13 : f32 to vector<8x32xf32>
    %cst_14 = arith.constant 0.000000e+00 : f32
    %30 = vector.broadcast %cst_14 : f32 to vector<8x32xf32>
    %c0_15 = arith.constant 0 : index
    %c0_16 = arith.constant 0 : index
    %c0_17 = arith.constant 0 : index
    %c0_18 = arith.constant 0 : index
    %31 = vector.load %arg2[%c0_15, %c0_16, %c0_17, %c0_18] : memref<3x4x32x8xf32, #tpu.memory_space<vmem>>, vector<1x1x32x8xf32>
    %32 = vector.shape_cast %31 : vector<1x1x32x8xf32> to vector<32x8xf32>
    %cst_19 = arith.constant dense<0.000000e+00> : vector<16x8xf32>
    %33 = tpu.matmul %28, %32, %cst_19 {dimension_numbers = #tpu.dot_dimension_numbers<[1], [0], [0], [1], [0, 0, 1, 1], [], []>} : vector<16x32xf32>, vector<32x8xf32>, vector<16x8xf32> -> vector<16x8xf32>
    %c0_20 = arith.constant 0 : index
    %c0_21 = arith.constant 0 : index
    %c0_22 = arith.constant 0 : index
    %c0_23 = arith.constant 0 : index
    %34 = vector.load %arg3[%c0_20, %c0_21, %c0_22, %c0_23] : memref<3x4x1x8xf32, #tpu.memory_space<vmem>>, vector<1x1x1x8xf32>
    %35 = vector.shape_cast %34 : vector<1x1x1x8xf32> to vector<1x8xf32>
    %36 = vector.broadcast %35 : vector<1x8xf32> to vector<16x8xf32>
    %37 = arith.addf %33, %36 : vector<16x8xf32>
    %c1_24 = arith.constant 1 : index
    %c0_25 = arith.constant 0 : index
    %c0_26 = arith.constant 0 : index
    %c0_27 = arith.constant 0 : index
    %38 = vector.load %arg2[%c1_24, %c0_25, %c0_26, %c0_27] : memref<3x4x32x8xf32, #tpu.memory_space<vmem>>, vector<1x1x32x8xf32>
    %39 = vector.shape_cast %38 : vector<1x1x32x8xf32> to vector<32x8xf32>
    %cst_28 = arith.constant dense<0.000000e+00> : vector<16x8xf32>
    %40 = tpu.matmul %1, %39, %cst_28 {dimension_numbers = #tpu.dot_dimension_numbers<[1], [0], [0], [1], [0, 0, 1, 1], [], []>} : vector<16x32xf32>, vector<32x8xf32>, vector<16x8xf32> -> vector<16x8xf32>
    %c1_29 = arith.constant 1 : index
    %c0_30 = arith.constant 0 : index
    %c0_31 = arith.constant 0 : index
    %c0_32 = arith.constant 0 : index
    %41 = vector.load %arg3[%c1_29, %c0_30, %c0_31, %c0_32] : memref<3x4x1x8xf32, #tpu.memory_space<vmem>>, vector<1x1x1x8xf32>
    %42 = vector.shape_cast %41 : vector<1x1x1x8xf32> to vector<1x8xf32>
    %43 = vector.broadcast %42 : vector<1x8xf32> to vector<16x8xf32>
    %44 = arith.addf %40, %43 : vector<16x8xf32>
    %c2_33 = arith.constant 2 : index
    %c0_34 = arith.constant 0 : index
    %c0_35 = arith.constant 0 : index
    %c0_36 = arith.constant 0 : index
    %45 = vector.load %arg2[%c2_33, %c0_34, %c0_35, %c0_36] : memref<3x4x32x8xf32, #tpu.memory_space<vmem>>, vector<1x1x32x8xf32>
    %46 = vector.shape_cast %45 : vector<1x1x32x8xf32> to vector<32x8xf32>
    %cst_37 = arith.constant dense<0.000000e+00> : vector<16x8xf32>
    %47 = tpu.matmul %1, %46, %cst_37 {dimension_numbers = #tpu.dot_dimension_numbers<[1], [0], [0], [1], [0, 0, 1, 1], [], []>} : vector<16x32xf32>, vector<32x8xf32>, vector<16x8xf32> -> vector<16x8xf32>
    %c2_38 = arith.constant 2 : index
    %c0_39 = arith.constant 0 : index
    %c0_40 = arith.constant 0 : index
    %c0_41 = arith.constant 0 : index
    %48 = vector.load %arg3[%c2_38, %c0_39, %c0_40, %c0_41] : memref<3x4x1x8xf32, #tpu.memory_space<vmem>>, vector<1x1x1x8xf32>
    %49 = vector.shape_cast %48 : vector<1x1x1x8xf32> to vector<1x8xf32>
    %50 = vector.broadcast %49 : vector<1x8xf32> to vector<16x8xf32>
    %51 = arith.addf %47, %50 : vector<16x8xf32>
    %c0_42 = arith.constant 0 : index
    %c0_43 = arith.constant 0 : index
    %c0_44 = arith.constant 0 : index
    %52 = vector.load %arg4[%c0_42, %c0_43, %c0_44] : memref<4x8x32xf32, #tpu.memory_space<vmem>>, vector<1x8x32xf32>
    %53 = vector.shape_cast %52 : vector<1x8x32xf32> to vector<8x32xf32>
    %54 = vector.extract_strided_slice %37 {offsets = [0, 0], sizes = [8, 8], strides = [1, 1]} : vector<16x8xf32> to vector<8x8xf32>
    %55 = vector.extract_strided_slice %44 {offsets = [0, 0], sizes = [8, 8], strides = [1, 1]} : vector<16x8xf32> to vector<8x8xf32>
    %56 = vector.extract_strided_slice %51 {offsets = [0, 0], sizes = [8, 8], strides = [1, 1]} : vector<16x8xf32> to vector<8x8xf32>
    %cst_45 = arith.constant dense<0.000000e+00> : vector<8x8xf32>
    %57 = tpu.matmul %54, %55, %cst_45 {dimension_numbers = #tpu.dot_dimension_numbers<[1], [1], [0], [0], [0, 0, 1, 0], [], []>} : vector<8x8xf32>, vector<8x8xf32>, vector<8x8xf32> -> vector<8x8xf32>
    %cst_46 = arith.constant dense<0xFF800000> : vector<8xf32>
    %58 = vector.multi_reduction <maximumf>, %57, %cst_46 [1] : vector<8x8xf32> to vector<8xf32>
    %59 = vector.shape_cast %58 : vector<8xf32> to vector<8x1xf32>
    %60 = vector.broadcast %59 : vector<8x1xf32> to vector<8x8xf32>
    %61 = arith.subf %57, %60 : vector<8x8xf32>
    %62 = math.exp %61 : vector<8x8xf32>
    %cst_47 = arith.constant dense<0.000000e+00> : vector<8xf32>
    %63 = vector.multi_reduction <add>, %62, %cst_47 [1] : vector<8x8xf32> to vector<8xf32>
    %64 = vector.shape_cast %63 : vector<8xf32> to vector<8x1xf32>
    %65 = tpu.reciprocal %64 : vector<8x1xf32> -> vector<8x1xf32>
    %66 = vector.broadcast %65 : vector<8x1xf32> to vector<8x8xf32>
    %67 = arith.mulf %62, %66 : vector<8x8xf32>
    %cst_48 = arith.constant dense<0.000000e+00> : vector<8x8xf32>
    %68 = tpu.matmul %67, %56, %cst_48 {dimension_numbers = #tpu.dot_dimension_numbers<[1], [0], [0], [1], [0, 0, 1, 1], [], []>} : vector<8x8xf32>, vector<8x8xf32>, vector<8x8xf32> -> vector<8x8xf32>
    %cst_49 = arith.constant dense<0.000000e+00> : vector<8x32xf32>
    %69 = tpu.matmul %68, %53, %cst_49 {dimension_numbers = #tpu.dot_dimension_numbers<[1], [0], [0], [1], [0, 0, 1, 1], [], []>} : vector<8x8xf32>, vector<8x32xf32>, vector<8x32xf32> -> vector<8x32xf32>
    %70 = arith.addf %29, %69 : vector<8x32xf32>
    %71 = vector.extract_strided_slice %37 {offsets = [8, 0], sizes = [8, 8], strides = [1, 1]} : vector<16x8xf32> to vector<8x8xf32>
    %72 = vector.extract_strided_slice %44 {offsets = [8, 0], sizes = [8, 8], strides = [1, 1]} : vector<16x8xf32> to vector<8x8xf32>
    %73 = vector.extract_strided_slice %51 {offsets = [8, 0], sizes = [8, 8], strides = [1, 1]} : vector<16x8xf32> to vector<8x8xf32>
    %cst_50 = arith.constant dense<0.000000e+00> : vector<8x8xf32>
    %74 = tpu.matmul %71, %72, %cst_50 {dimension_numbers = #tpu.dot_dimension_numbers<[1], [1], [0], [0], [0, 0, 1, 0], [], []>} : vector<8x8xf32>, vector<8x8xf32>, vector<8x8xf32> -> vector<8x8xf32>
    %cst_51 = arith.constant dense<0xFF800000> : vector<8xf32>
    %75 = vector.multi_reduction <maximumf>, %74, %cst_51 [1] : vector<8x8xf32> to vector<8xf32>
    %76 = vector.shape_cast %75 : vector<8xf32> to vector<8x1xf32>
    %77 = vector.broadcast %76 : vector<8x1xf32> to vector<8x8xf32>
    %78 = arith.subf %74, %77 : vector<8x8xf32>
    %79 = math.exp %78 : vector<8x8xf32>
    %cst_52 = arith.constant dense<0.000000e+00> : vector<8xf32>
    %80 = vector.multi_reduction <add>, %79, %cst_52 [1] : vector<8x8xf32> to vector<8xf32>
    %81 = vector.shape_cast %80 : vector<8xf32> to vector<8x1xf32>
    %82 = tpu.reciprocal %81 : vector<8x1xf32> -> vector<8x1xf32>
    %83 = vector.broadcast %82 : vector<8x1xf32> to vector<8x8xf32>
    %84 = arith.mulf %79, %83 : vector<8x8xf32>
    %cst_53 = arith.constant dense<0.000000e+00> : vector<8x8xf32>
    %85 = tpu.matmul %84, %73, %cst_53 {dimension_numbers = #tpu.dot_dimension_numbers<[1], [0], [0], [1], [0, 0, 1, 1], [], []>} : vector<8x8xf32>, vector<8x8xf32>, vector<8x8xf32> -> vector<8x8xf32>
    %cst_54 = arith.constant dense<0.000000e+00> : vector<8x32xf32>
    %86 = tpu.matmul %85, %53, %cst_54 {dimension_numbers = #tpu.dot_dimension_numbers<[1], [0], [0], [1], [0, 0, 1, 1], [], []>} : vector<8x8xf32>, vector<8x32xf32>, vector<8x32xf32> -> vector<8x32xf32>
    %87 = arith.addf %30, %86 : vector<8x32xf32>
    %c0_55 = arith.constant 0 : index
    %c1_56 = arith.constant 1 : index
    %c0_57 = arith.constant 0 : index
    %c0_58 = arith.constant 0 : index
    %88 = vector.load %arg2[%c0_55, %c1_56, %c0_57, %c0_58] : memref<3x4x32x8xf32, #tpu.memory_space<vmem>>, vector<1x1x32x8xf32>
    %89 = vector.shape_cast %88 : vector<1x1x32x8xf32> to vector<32x8xf32>
    %cst_59 = arith.constant dense<0.000000e+00> : vector<16x8xf32>
    %90 = tpu.matmul %28, %89, %cst_59 {dimension_numbers = #tpu.dot_dimension_numbers<[1], [0], [0], [1], [0, 0, 1, 1], [], []>} : vector<16x32xf32>, vector<32x8xf32>, vector<16x8xf32> -> vector<16x8xf32>
    %c0_60 = arith.constant 0 : index
    %c1_61 = arith.constant 1 : index
    %c0_62 = arith.constant 0 : index
    %c0_63 = arith.constant 0 : index
    %91 = vector.load %arg3[%c0_60, %c1_61, %c0_62, %c0_63] : memref<3x4x1x8xf32, #tpu.memory_space<vmem>>, vector<1x1x1x8xf32>
    %92 = vector.shape_cast %91 : vector<1x1x1x8xf32> to vector<1x8xf32>
    %93 = vector.broadcast %92 : vector<1x8xf32> to vector<16x8xf32>
    %94 = arith.addf %90, %93 : vector<16x8xf32>
    %c1_64 = arith.constant 1 : index
    %c1_65 = arith.constant 1 : index
    %c0_66 = arith.constant 0 : index
    %c0_67 = arith.constant 0 : index
    %95 = vector.load %arg2[%c1_64, %c1_65, %c0_66, %c0_67] : memref<3x4x32x8xf32, #tpu.memory_space<vmem>>, vector<1x1x32x8xf32>
    %96 = vector.shape_cast %95 : vector<1x1x32x8xf32> to vector<32x8xf32>
    %cst_68 = arith.constant dense<0.000000e+00> : vector<16x8xf32>
    %97 = tpu.matmul %1, %96, %cst_68 {dimension_numbers = #tpu.dot_dimension_numbers<[1], [0], [0], [1], [0, 0, 1, 1], [], []>} : vector<16x32xf32>, vector<32x8xf32>, vector<16x8xf32> -> vector<16x8xf32>
    %c1_69 = arith.constant 1 : index
    %c1_70 = arith.constant 1 : index
    %c0_71 = arith.constant 0 : index
    %c0_72 = arith.constant 0 : index
    %98 = vector.load %arg3[%c1_69, %c1_70, %c0_71, %c0_72] : memref<3x4x1x8xf32, #tpu.memory_space<vmem>>, vector<1x1x1x8xf32>
    %99 = vector.shape_cast %98 : vector<1x1x1x8xf32> to vector<1x8xf32>
    %100 = vector.broadcast %99 : vector<1x8xf32> to vector<16x8xf32>
    %101 = arith.addf %97, %100 : vector<16x8xf32>
    %c2_73 = arith.constant 2 : index
    %c1_74 = arith.constant 1 : index
    %c0_75 = arith.constant 0 : index
    %c0_76 = arith.constant 0 : index
    %102 = vector.load %arg2[%c2_73, %c1_74, %c0_75, %c0_76] : memref<3x4x32x8xf32, #tpu.memory_space<vmem>>, vector<1x1x32x8xf32>
    %103 = vector.shape_cast %102 : vector<1x1x32x8xf32> to vector<32x8xf32>
    %cst_77 = arith.constant dense<0.000000e+00> : vector<16x8xf32>
    %104 = tpu.matmul %1, %103, %cst_77 {dimension_numbers = #tpu.dot_dimension_numbers<[1], [0], [0], [1], [0, 0, 1, 1], [], []>} : vector<16x32xf32>, vector<32x8xf32>, vector<16x8xf32> -> vector<16x8xf32>
    %c2_78 = arith.constant 2 : index
    %c1_79 = arith.constant 1 : index
    %c0_80 = arith.constant 0 : index
    %c0_81 = arith.constant 0 : index
    %105 = vector.load %arg3[%c2_78, %c1_79, %c0_80, %c0_81] : memref<3x4x1x8xf32, #tpu.memory_space<vmem>>, vector<1x1x1x8xf32>
    %106 = vector.shape_cast %105 : vector<1x1x1x8xf32> to vector<1x8xf32>
    %107 = vector.broadcast %106 : vector<1x8xf32> to vector<16x8xf32>
    %108 = arith.addf %104, %107 : vector<16x8xf32>
    %c1_82 = arith.constant 1 : index
    %c0_83 = arith.constant 0 : index
    %c0_84 = arith.constant 0 : index
    %109 = vector.load %arg4[%c1_82, %c0_83, %c0_84] : memref<4x8x32xf32, #tpu.memory_space<vmem>>, vector<1x8x32xf32>
    %110 = vector.shape_cast %109 : vector<1x8x32xf32> to vector<8x32xf32>
    %111 = vector.extract_strided_slice %94 {offsets = [0, 0], sizes = [8, 8], strides = [1, 1]} : vector<16x8xf32> to vector<8x8xf32>
    %112 = vector.extract_strided_slice %101 {offsets = [0, 0], sizes = [8, 8], strides = [1, 1]} : vector<16x8xf32> to vector<8x8xf32>
    %113 = vector.extract_strided_slice %108 {offsets = [0, 0], sizes = [8, 8], strides = [1, 1]} : vector<16x8xf32> to vector<8x8xf32>
    %cst_85 = arith.constant dense<0.000000e+00> : vector<8x8xf32>
    %114 = tpu.matmul %111, %112, %cst_85 {dimension_numbers = #tpu.dot_dimension_numbers<[1], [1], [0], [0], [0, 0, 1, 0], [], []>} : vector<8x8xf32>, vector<8x8xf32>, vector<8x8xf32> -> vector<8x8xf32>
    %cst_86 = arith.constant dense<0xFF800000> : vector<8xf32>
    %115 = vector.multi_reduction <maximumf>, %114, %cst_86 [1] : vector<8x8xf32> to vector<8xf32>
    %116 = vector.shape_cast %115 : vector<8xf32> to vector<8x1xf32>
    %117 = vector.broadcast %116 : vector<8x1xf32> to vector<8x8xf32>
    %118 = arith.subf %114, %117 : vector<8x8xf32>
    %119 = math.exp %118 : vector<8x8xf32>
    %cst_87 = arith.constant dense<0.000000e+00> : vector<8xf32>
    %120 = vector.multi_reduction <add>, %119, %cst_87 [1] : vector<8x8xf32> to vector<8xf32>
    %121 = vector.shape_cast %120 : vector<8xf32> to vector<8x1xf32>
    %122 = tpu.reciprocal %121 : vector<8x1xf32> -> vector<8x1xf32>
    %123 = vector.broadcast %122 : vector<8x1xf32> to vector<8x8xf32>
    %124 = arith.mulf %119, %123 : vector<8x8xf32>
    %cst_88 = arith.constant dense<0.000000e+00> : vector<8x8xf32>
    %125 = tpu.matmul %124, %113, %cst_88 {dimension_numbers = #tpu.dot_dimension_numbers<[1], [0], [0], [1], [0, 0, 1, 1], [], []>} : vector<8x8xf32>, vector<8x8xf32>, vector<8x8xf32> -> vector<8x8xf32>
    %cst_89 = arith.constant dense<0.000000e+00> : vector<8x32xf32>
    %126 = tpu.matmul %125, %110, %cst_89 {dimension_numbers = #tpu.dot_dimension_numbers<[1], [0], [0], [1], [0, 0, 1, 1], [], []>} : vector<8x8xf32>, vector<8x32xf32>, vector<8x32xf32> -> vector<8x32xf32>
    %127 = arith.addf %70, %126 : vector<8x32xf32>
    %128 = vector.extract_strided_slice %94 {offsets = [8, 0], sizes = [8, 8], strides = [1, 1]} : vector<16x8xf32> to vector<8x8xf32>
    %129 = vector.extract_strided_slice %101 {offsets = [8, 0], sizes = [8, 8], strides = [1, 1]} : vector<16x8xf32> to vector<8x8xf32>
    %130 = vector.extract_strided_slice %108 {offsets = [8, 0], sizes = [8, 8], strides = [1, 1]} : vector<16x8xf32> to vector<8x8xf32>
    %cst_90 = arith.constant dense<0.000000e+00> : vector<8x8xf32>
    %131 = tpu.matmul %128, %129, %cst_90 {dimension_numbers = #tpu.dot_dimension_numbers<[1], [1], [0], [0], [0, 0, 1, 0], [], []>} : vector<8x8xf32>, vector<8x8xf32>, vector<8x8xf32> -> vector<8x8xf32>
    %cst_91 = arith.constant dense<0xFF800000> : vector<8xf32>
    %132 = vector.multi_reduction <maximumf>, %131, %cst_91 [1] : vector<8x8xf32> to vector<8xf32>
    %133 = vector.shape_cast %132 : vector<8xf32> to vector<8x1xf32>
    %134 = vector.broadcast %133 : vector<8x1xf32> to vector<8x8xf32>
    %135 = arith.subf %131, %134 : vector<8x8xf32>
    %136 = math.exp %135 : vector<8x8xf32>
    %cst_92 = arith.constant dense<0.000000e+00> : vector<8xf32>
    %137 = vector.multi_reduction <add>, %136, %cst_92 [1] : vector<8x8xf32> to vector<8xf32>
    %138 = vector.shape_cast %137 : vector<8xf32> to vector<8x1xf32>
    %139 = tpu.reciprocal %138 : vector<8x1xf32> -> vector<8x1xf32>
    %140 = vector.broadcast %139 : vector<8x1xf32> to vector<8x8xf32>
    %141 = arith.mulf %136, %140 : vector<8x8xf32>
    %cst_93 = arith.constant dense<0.000000e+00> : vector<8x8xf32>
    %142 = tpu.matmul %141, %130, %cst_93 {dimension_numbers = #tpu.dot_dimension_numbers<[1], [0], [0], [1], [0, 0, 1, 1], [], []>} : vector<8x8xf32>, vector<8x8xf32>, vector<8x8xf32> -> vector<8x8xf32>
    %cst_94 = arith.constant dense<0.000000e+00> : vector<8x32xf32>
    %143 = tpu.matmul %142, %110, %cst_94 {dimension_numbers = #tpu.dot_dimension_numbers<[1], [0], [0], [1], [0, 0, 1, 1], [], []>} : vector<8x8xf32>, vector<8x32xf32>, vector<8x32xf32> -> vector<8x32xf32>
    %144 = arith.addf %87, %143 : vector<8x32xf32>
    %c0_95 = arith.constant 0 : index
    %c2_96 = arith.constant 2 : index
    %c0_97 = arith.constant 0 : index
    %c0_98 = arith.constant 0 : index
    %145 = vector.load %arg2[%c0_95, %c2_96, %c0_97, %c0_98] : memref<3x4x32x8xf32, #tpu.memory_space<vmem>>, vector<1x1x32x8xf32>
    %146 = vector.shape_cast %145 : vector<1x1x32x8xf32> to vector<32x8xf32>
    %cst_99 = arith.constant dense<0.000000e+00> : vector<16x8xf32>
    %147 = tpu.matmul %28, %146, %cst_99 {dimension_numbers = #tpu.dot_dimension_numbers<[1], [0], [0], [1], [0, 0, 1, 1], [], []>} : vector<16x32xf32>, vector<32x8xf32>, vector<16x8xf32> -> vector<16x8xf32>
    %c0_100 = arith.constant 0 : index
    %c2_101 = arith.constant 2 : index
    %c0_102 = arith.constant 0 : index
    %c0_103 = arith.constant 0 : index
    %148 = vector.load %arg3[%c0_100, %c2_101, %c0_102, %c0_103] : memref<3x4x1x8xf32, #tpu.memory_space<vmem>>, vector<1x1x1x8xf32>
    %149 = vector.shape_cast %148 : vector<1x1x1x8xf32> to vector<1x8xf32>
    %150 = vector.broadcast %149 : vector<1x8xf32> to vector<16x8xf32>
    %151 = arith.addf %147, %150 : vector<16x8xf32>
    %c1_104 = arith.constant 1 : index
    %c2_105 = arith.constant 2 : index
    %c0_106 = arith.constant 0 : index
    %c0_107 = arith.constant 0 : index
    %152 = vector.load %arg2[%c1_104, %c2_105, %c0_106, %c0_107] : memref<3x4x32x8xf32, #tpu.memory_space<vmem>>, vector<1x1x32x8xf32>
    %153 = vector.shape_cast %152 : vector<1x1x32x8xf32> to vector<32x8xf32>
    %cst_108 = arith.constant dense<0.000000e+00> : vector<16x8xf32>
    %154 = tpu.matmul %1, %153, %cst_108 {dimension_numbers = #tpu.dot_dimension_numbers<[1], [0], [0], [1], [0, 0, 1, 1], [], []>} : vector<16x32xf32>, vector<32x8xf32>, vector<16x8xf32> -> vector<16x8xf32>
    %c1_109 = arith.constant 1 : index
    %c2_110 = arith.constant 2 : index
    %c0_111 = arith.constant 0 : index
    %c0_112 = arith.constant 0 : index
    %155 = vector.load %arg3[%c1_109, %c2_110, %c0_111, %c0_112] : memref<3x4x1x8xf32, #tpu.memory_space<vmem>>, vector<1x1x1x8xf32>
    %156 = vector.shape_cast %155 : vector<1x1x1x8xf32> to vector<1x8xf32>
    %157 = vector.broadcast %156 : vector<1x8xf32> to vector<16x8xf32>
    %158 = arith.addf %154, %157 : vector<16x8xf32>
    %c2_113 = arith.constant 2 : index
    %c2_114 = arith.constant 2 : index
    %c0_115 = arith.constant 0 : index
    %c0_116 = arith.constant 0 : index
    %159 = vector.load %arg2[%c2_113, %c2_114, %c0_115, %c0_116] : memref<3x4x32x8xf32, #tpu.memory_space<vmem>>, vector<1x1x32x8xf32>
    %160 = vector.shape_cast %159 : vector<1x1x32x8xf32> to vector<32x8xf32>
    %cst_117 = arith.constant dense<0.000000e+00> : vector<16x8xf32>
    %161 = tpu.matmul %1, %160, %cst_117 {dimension_numbers = #tpu.dot_dimension_numbers<[1], [0], [0], [1], [0, 0, 1, 1], [], []>} : vector<16x32xf32>, vector<32x8xf32>, vector<16x8xf32> -> vector<16x8xf32>
    %c2_118 = arith.constant 2 : index
    %c2_119 = arith.constant 2 : index
    %c0_120 = arith.constant 0 : index
    %c0_121 = arith.constant 0 : index
    %162 = vector.load %arg3[%c2_118, %c2_119, %c0_120, %c0_121] : memref<3x4x1x8xf32, #tpu.memory_space<vmem>>, vector<1x1x1x8xf32>
    %163 = vector.shape_cast %162 : vector<1x1x1x8xf32> to vector<1x8xf32>
    %164 = vector.broadcast %163 : vector<1x8xf32> to vector<16x8xf32>
    %165 = arith.addf %161, %164 : vector<16x8xf32>
    %c2_122 = arith.constant 2 : index
    %c0_123 = arith.constant 0 : index
    %c0_124 = arith.constant 0 : index
    %166 = vector.load %arg4[%c2_122, %c0_123, %c0_124] : memref<4x8x32xf32, #tpu.memory_space<vmem>>, vector<1x8x32xf32>
    %167 = vector.shape_cast %166 : vector<1x8x32xf32> to vector<8x32xf32>
    %168 = vector.extract_strided_slice %151 {offsets = [0, 0], sizes = [8, 8], strides = [1, 1]} : vector<16x8xf32> to vector<8x8xf32>
    %169 = vector.extract_strided_slice %158 {offsets = [0, 0], sizes = [8, 8], strides = [1, 1]} : vector<16x8xf32> to vector<8x8xf32>
    %170 = vector.extract_strided_slice %165 {offsets = [0, 0], sizes = [8, 8], strides = [1, 1]} : vector<16x8xf32> to vector<8x8xf32>
    %cst_125 = arith.constant dense<0.000000e+00> : vector<8x8xf32>
    %171 = tpu.matmul %168, %169, %cst_125 {dimension_numbers = #tpu.dot_dimension_numbers<[1], [1], [0], [0], [0, 0, 1, 0], [], []>} : vector<8x8xf32>, vector<8x8xf32>, vector<8x8xf32> -> vector<8x8xf32>
    %cst_126 = arith.constant dense<0xFF800000> : vector<8xf32>
    %172 = vector.multi_reduction <maximumf>, %171, %cst_126 [1] : vector<8x8xf32> to vector<8xf32>
    %173 = vector.shape_cast %172 : vector<8xf32> to vector<8x1xf32>
    %174 = vector.broadcast %173 : vector<8x1xf32> to vector<8x8xf32>
    %175 = arith.subf %171, %174 : vector<8x8xf32>
    %176 = math.exp %175 : vector<8x8xf32>
    %cst_127 = arith.constant dense<0.000000e+00> : vector<8xf32>
    %177 = vector.multi_reduction <add>, %176, %cst_127 [1] : vector<8x8xf32> to vector<8xf32>
    %178 = vector.shape_cast %177 : vector<8xf32> to vector<8x1xf32>
    %179 = tpu.reciprocal %178 : vector<8x1xf32> -> vector<8x1xf32>
    %180 = vector.broadcast %179 : vector<8x1xf32> to vector<8x8xf32>
    %181 = arith.mulf %176, %180 : vector<8x8xf32>
    %cst_128 = arith.constant dense<0.000000e+00> : vector<8x8xf32>
    %182 = tpu.matmul %181, %170, %cst_128 {dimension_numbers = #tpu.dot_dimension_numbers<[1], [0], [0], [1], [0, 0, 1, 1], [], []>} : vector<8x8xf32>, vector<8x8xf32>, vector<8x8xf32> -> vector<8x8xf32>
    %cst_129 = arith.constant dense<0.000000e+00> : vector<8x32xf32>
    %183 = tpu.matmul %182, %167, %cst_129 {dimension_numbers = #tpu.dot_dimension_numbers<[1], [0], [0], [1], [0, 0, 1, 1], [], []>} : vector<8x8xf32>, vector<8x32xf32>, vector<8x32xf32> -> vector<8x32xf32>
    %184 = arith.addf %127, %183 : vector<8x32xf32>
    %185 = vector.extract_strided_slice %151 {offsets = [8, 0], sizes = [8, 8], strides = [1, 1]} : vector<16x8xf32> to vector<8x8xf32>
    %186 = vector.extract_strided_slice %158 {offsets = [8, 0], sizes = [8, 8], strides = [1, 1]} : vector<16x8xf32> to vector<8x8xf32>
    %187 = vector.extract_strided_slice %165 {offsets = [8, 0], sizes = [8, 8], strides = [1, 1]} : vector<16x8xf32> to vector<8x8xf32>
    %cst_130 = arith.constant dense<0.000000e+00> : vector<8x8xf32>
    %188 = tpu.matmul %185, %186, %cst_130 {dimension_numbers = #tpu.dot_dimension_numbers<[1], [1], [0], [0], [0, 0, 1, 0], [], []>} : vector<8x8xf32>, vector<8x8xf32>, vector<8x8xf32> -> vector<8x8xf32>
    %cst_131 = arith.constant dense<0xFF800000> : vector<8xf32>
    %189 = vector.multi_reduction <maximumf>, %188, %cst_131 [1] : vector<8x8xf32> to vector<8xf32>
    %190 = vector.shape_cast %189 : vector<8xf32> to vector<8x1xf32>
    %191 = vector.broadcast %190 : vector<8x1xf32> to vector<8x8xf32>
    %192 = arith.subf %188, %191 : vector<8x8xf32>
    %193 = math.exp %192 : vector<8x8xf32>
    %cst_132 = arith.constant dense<0.000000e+00> : vector<8xf32>
    %194 = vector.multi_reduction <add>, %193, %cst_132 [1] : vector<8x8xf32> to vector<8xf32>
    %195 = vector.shape_cast %194 : vector<8xf32> to vector<8x1xf32>
    %196 = tpu.reciprocal %195 : vector<8x1xf32> -> vector<8x1xf32>
    %197 = vector.broadcast %196 : vector<8x1xf32> to vector<8x8xf32>
    %198 = arith.mulf %193, %197 : vector<8x8xf32>
    %cst_133 = arith.constant dense<0.000000e+00> : vector<8x8xf32>
    %199 = tpu.matmul %198, %187, %cst_133 {dimension_numbers = #tpu.dot_dimension_numbers<[1], [0], [0], [1], [0, 0, 1, 1], [], []>} : vector<8x8xf32>, vector<8x8xf32>, vector<8x8xf32> -> vector<8x8xf32>
    %cst_134 = arith.constant dense<0.000000e+00> : vector<8x32xf32>
    %200 = tpu.matmul %199, %167, %cst_134 {dimension_numbers = #tpu.dot_dimension_numbers<[1], [0], [0], [1], [0, 0, 1, 1], [], []>} : vector<8x8xf32>, vector<8x32xf32>, vector<8x32xf32> -> vector<8x32xf32>
    %201 = arith.addf %144, %200 : vector<8x32xf32>
    %c0_135 = arith.constant 0 : index
    %c3_136 = arith.constant 3 : index
    %c0_137 = arith.constant 0 : index
    %c0_138 = arith.constant 0 : index
    %202 = vector.load %arg2[%c0_135, %c3_136, %c0_137, %c0_138] : memref<3x4x32x8xf32, #tpu.memory_space<vmem>>, vector<1x1x32x8xf32>
    %203 = vector.shape_cast %202 : vector<1x1x32x8xf32> to vector<32x8xf32>
    %cst_139 = arith.constant dense<0.000000e+00> : vector<16x8xf32>
    %204 = tpu.matmul %28, %203, %cst_139 {dimension_numbers = #tpu.dot_dimension_numbers<[1], [0], [0], [1], [0, 0, 1, 1], [], []>} : vector<16x32xf32>, vector<32x8xf32>, vector<16x8xf32> -> vector<16x8xf32>
    %c0_140 = arith.constant 0 : index
    %c3_141 = arith.constant 3 : index
    %c0_142 = arith.constant 0 : index
    %c0_143 = arith.constant 0 : index
    %205 = vector.load %arg3[%c0_140, %c3_141, %c0_142, %c0_143] : memref<3x4x1x8xf32, #tpu.memory_space<vmem>>, vector<1x1x1x8xf32>
    %206 = vector.shape_cast %205 : vector<1x1x1x8xf32> to vector<1x8xf32>
    %207 = vector.broadcast %206 : vector<1x8xf32> to vector<16x8xf32>
    %208 = arith.addf %204, %207 : vector<16x8xf32>
    %c1_144 = arith.constant 1 : index
    %c3_145 = arith.constant 3 : index
    %c0_146 = arith.constant 0 : index
    %c0_147 = arith.constant 0 : index
    %209 = vector.load %arg2[%c1_144, %c3_145, %c0_146, %c0_147] : memref<3x4x32x8xf32, #tpu.memory_space<vmem>>, vector<1x1x32x8xf32>
    %210 = vector.shape_cast %209 : vector<1x1x32x8xf32> to vector<32x8xf32>
    %cst_148 = arith.constant dense<0.000000e+00> : vector<16x8xf32>
    %211 = tpu.matmul %1, %210, %cst_148 {dimension_numbers = #tpu.dot_dimension_numbers<[1], [0], [0], [1], [0, 0, 1, 1], [], []>} : vector<16x32xf32>, vector<32x8xf32>, vector<16x8xf32> -> vector<16x8xf32>
    %c1_149 = arith.constant 1 : index
    %c3_150 = arith.constant 3 : index
    %c0_151 = arith.constant 0 : index
    %c0_152 = arith.constant 0 : index
    %212 = vector.load %arg3[%c1_149, %c3_150, %c0_151, %c0_152] : memref<3x4x1x8xf32, #tpu.memory_space<vmem>>, vector<1x1x1x8xf32>
    %213 = vector.shape_cast %212 : vector<1x1x1x8xf32> to vector<1x8xf32>
    %214 = vector.broadcast %213 : vector<1x8xf32> to vector<16x8xf32>
    %215 = arith.addf %211, %214 : vector<16x8xf32>
    %c2_153 = arith.constant 2 : index
    %c3_154 = arith.constant 3 : index
    %c0_155 = arith.constant 0 : index
    %c0_156 = arith.constant 0 : index
    %216 = vector.load %arg2[%c2_153, %c3_154, %c0_155, %c0_156] : memref<3x4x32x8xf32, #tpu.memory_space<vmem>>, vector<1x1x32x8xf32>
    %217 = vector.shape_cast %216 : vector<1x1x32x8xf32> to vector<32x8xf32>
    %cst_157 = arith.constant dense<0.000000e+00> : vector<16x8xf32>
    %218 = tpu.matmul %1, %217, %cst_157 {dimension_numbers = #tpu.dot_dimension_numbers<[1], [0], [0], [1], [0, 0, 1, 1], [], []>} : vector<16x32xf32>, vector<32x8xf32>, vector<16x8xf32> -> vector<16x8xf32>
    %c2_158 = arith.constant 2 : index
    %c3_159 = arith.constant 3 : index
    %c0_160 = arith.constant 0 : index
    %c0_161 = arith.constant 0 : index
    %219 = vector.load %arg3[%c2_158, %c3_159, %c0_160, %c0_161] : memref<3x4x1x8xf32, #tpu.memory_space<vmem>>, vector<1x1x1x8xf32>
    %220 = vector.shape_cast %219 : vector<1x1x1x8xf32> to vector<1x8xf32>
    %221 = vector.broadcast %220 : vector<1x8xf32> to vector<16x8xf32>
    %222 = arith.addf %218, %221 : vector<16x8xf32>
    %c3_162 = arith.constant 3 : index
    %c0_163 = arith.constant 0 : index
    %c0_164 = arith.constant 0 : index
    %223 = vector.load %arg4[%c3_162, %c0_163, %c0_164] : memref<4x8x32xf32, #tpu.memory_space<vmem>>, vector<1x8x32xf32>
    %224 = vector.shape_cast %223 : vector<1x8x32xf32> to vector<8x32xf32>
    %225 = vector.extract_strided_slice %208 {offsets = [0, 0], sizes = [8, 8], strides = [1, 1]} : vector<16x8xf32> to vector<8x8xf32>
    %226 = vector.extract_strided_slice %215 {offsets = [0, 0], sizes = [8, 8], strides = [1, 1]} : vector<16x8xf32> to vector<8x8xf32>
    %227 = vector.extract_strided_slice %222 {offsets = [0, 0], sizes = [8, 8], strides = [1, 1]} : vector<16x8xf32> to vector<8x8xf32>
    %cst_165 = arith.constant dense<0.000000e+00> : vector<8x8xf32>
    %228 = tpu.matmul %225, %226, %cst_165 {dimension_numbers = #tpu.dot_dimension_numbers<[1], [1], [0], [0], [0, 0, 1, 0], [], []>} : vector<8x8xf32>, vector<8x8xf32>, vector<8x8xf32> -> vector<8x8xf32>
    %cst_166 = arith.constant dense<0xFF800000> : vector<8xf32>
    %229 = vector.multi_reduction <maximumf>, %228, %cst_166 [1] : vector<8x8xf32> to vector<8xf32>
    %230 = vector.shape_cast %229 : vector<8xf32> to vector<8x1xf32>
    %231 = vector.broadcast %230 : vector<8x1xf32> to vector<8x8xf32>
    %232 = arith.subf %228, %231 : vector<8x8xf32>
    %233 = math.exp %232 : vector<8x8xf32>
    %cst_167 = arith.constant dense<0.000000e+00> : vector<8xf32>
    %234 = vector.multi_reduction <add>, %233, %cst_167 [1] : vector<8x8xf32> to vector<8xf32>
    %235 = vector.shape_cast %234 : vector<8xf32> to vector<8x1xf32>
    %236 = tpu.reciprocal %235 : vector<8x1xf32> -> vector<8x1xf32>
    %237 = vector.broadcast %236 : vector<8x1xf32> to vector<8x8xf32>
    %238 = arith.mulf %233, %237 : vector<8x8xf32>
    %cst_168 = arith.constant dense<0.000000e+00> : vector<8x8xf32>
    %239 = tpu.matmul %238, %227, %cst_168 {dimension_numbers = #tpu.dot_dimension_numbers<[1], [0], [0], [1], [0, 0, 1, 1], [], []>} : vector<8x8xf32>, vector<8x8xf32>, vector<8x8xf32> -> vector<8x8xf32>
    %cst_169 = arith.constant dense<0.000000e+00> : vector<8x32xf32>
    %240 = tpu.matmul %239, %224, %cst_169 {dimension_numbers = #tpu.dot_dimension_numbers<[1], [0], [0], [1], [0, 0, 1, 1], [], []>} : vector<8x8xf32>, vector<8x32xf32>, vector<8x32xf32> -> vector<8x32xf32>
    %241 = arith.addf %184, %240 : vector<8x32xf32>
    %242 = vector.extract_strided_slice %208 {offsets = [8, 0], sizes = [8, 8], strides = [1, 1]} : vector<16x8xf32> to vector<8x8xf32>
    %243 = vector.extract_strided_slice %215 {offsets = [8, 0], sizes = [8, 8], strides = [1, 1]} : vector<16x8xf32> to vector<8x8xf32>
    %244 = vector.extract_strided_slice %222 {offsets = [8, 0], sizes = [8, 8], strides = [1, 1]} : vector<16x8xf32> to vector<8x8xf32>
    %cst_170 = arith.constant dense<0.000000e+00> : vector<8x8xf32>
    %245 = tpu.matmul %242, %243, %cst_170 {dimension_numbers = #tpu.dot_dimension_numbers<[1], [1], [0], [0], [0, 0, 1, 0], [], []>} : vector<8x8xf32>, vector<8x8xf32>, vector<8x8xf32> -> vector<8x8xf32>
    %cst_171 = arith.constant dense<0xFF800000> : vector<8xf32>
    %246 = vector.multi_reduction <maximumf>, %245, %cst_171 [1] : vector<8x8xf32> to vector<8xf32>
    %247 = vector.shape_cast %246 : vector<8xf32> to vector<8x1xf32>
    %248 = vector.broadcast %247 : vector<8x1xf32> to vector<8x8xf32>
    %249 = arith.subf %245, %248 : vector<8x8xf32>
    %250 = math.exp %249 : vector<8x8xf32>
    %cst_172 = arith.constant dense<0.000000e+00> : vector<8xf32>
    %251 = vector.multi_reduction <add>, %250, %cst_172 [1] : vector<8x8xf32> to vector<8xf32>
    %252 = vector.shape_cast %251 : vector<8xf32> to vector<8x1xf32>
    %253 = tpu.reciprocal %252 : vector<8x1xf32> -> vector<8x1xf32>
    %254 = vector.broadcast %253 : vector<8x1xf32> to vector<8x8xf32>
    %255 = arith.mulf %250, %254 : vector<8x8xf32>
    %cst_173 = arith.constant dense<0.000000e+00> : vector<8x8xf32>
    %256 = tpu.matmul %255, %244, %cst_173 {dimension_numbers = #tpu.dot_dimension_numbers<[1], [0], [0], [1], [0, 0, 1, 1], [], []>} : vector<8x8xf32>, vector<8x8xf32>, vector<8x8xf32> -> vector<8x8xf32>
    %cst_174 = arith.constant dense<0.000000e+00> : vector<8x32xf32>
    %257 = tpu.matmul %256, %224, %cst_174 {dimension_numbers = #tpu.dot_dimension_numbers<[1], [0], [0], [1], [0, 0, 1, 1], [], []>} : vector<8x8xf32>, vector<8x32xf32>, vector<8x32xf32> -> vector<8x32xf32>
    %258 = arith.addf %201, %257 : vector<8x32xf32>
    %259 = tpu.concatenate %241, %258 in 0 : vector<8x32xf32>, vector<8x32xf32> -> vector<16x32xf32>
    %260 = vector.broadcast %6 : vector<1x32xf32> to vector<16x32xf32>
    %261 = arith.addf %259, %260 : vector<16x32xf32>
    %262 = arith.addf %261, %0 : vector<16x32xf32>
    %cst_175 = arith.constant dense<0.000000e+00> : vector<16xf32>
    %263 = vector.multi_reduction <add>, %262, %cst_175 [1] : vector<16x32xf32> to vector<16xf32>
    %264 = vector.shape_cast %263 : vector<16xf32> to vector<16x1xf32>
    %cst_176 = arith.constant 3.200000e+01 : f32
    %265 = vector.broadcast %cst_176 : f32 to vector<16x1xf32>
    %266 = arith.divf %264, %265 : vector<16x1xf32>
    %267 = vector.broadcast %266 : vector<16x1xf32> to vector<16x32xf32>
    %268 = arith.subf %262, %267 : vector<16x32xf32>
    %269 = arith.mulf %268, %268 : vector<16x32xf32>
    %cst_177 = arith.constant dense<0.000000e+00> : vector<16xf32>
    %270 = vector.multi_reduction <add>, %269, %cst_177 [1] : vector<16x32xf32> to vector<16xf32>
    %271 = vector.shape_cast %270 : vector<16xf32> to vector<16x1xf32>
    %cst_178 = arith.constant 3.200000e+01 : f32
    %272 = vector.broadcast %cst_178 : f32 to vector<16x1xf32>
    %273 = arith.divf %271, %272 : vector<16x1xf32>
    %274 = vector.broadcast %266 : vector<16x1xf32> to vector<16x32xf32>
    %275 = arith.subf %262, %274 : vector<16x32xf32>
    %cst_179 = arith.constant 9.99999974E-6 : f32
    %276 = vector.broadcast %cst_179 : f32 to vector<16x1xf32>
    %277 = arith.addf %273, %276 : vector<16x1xf32>
    %278 = math.rsqrt %277 : vector<16x1xf32>
    %279 = vector.broadcast %278 : vector<16x1xf32> to vector<16x32xf32>
    %280 = arith.mulf %275, %279 : vector<16x32xf32>
    %281 = vector.broadcast %4 : vector<1x32xf32> to vector<16x32xf32>
    %282 = arith.mulf %280, %281 : vector<16x32xf32>
    %283 = vector.broadcast %5 : vector<1x32xf32> to vector<16x32xf32>
    %284 = arith.addf %282, %283 : vector<16x32xf32>
    %c0_180 = arith.constant 0 : index
    %c0_181 = arith.constant 0 : index
    %285 = vector.load %arg6[%c0_180, %c0_181] : memref<16x32xf32, #tpu.memory_space<vmem>>, vector<16x32xf32>
    tpu.vector_store %arg6[%c0_180, %c0_181], %284 {strides = array<i32>} : memref<16x32xf32, #tpu.memory_space<vmem>>, vector<16x32xf32>,
    return
  }
}

</mosaic_0001>

<bundles_post_ra>
// kernel: tpu_custom_call.1
= control target key start
LH: loop header
LB: loop body
LE: loop exit
PB: predicated region body
PF: predicated region fallthrough
CT: control target
= control target key end

     0   :  { %vm33_vm0 = vcmask 261120   ;;  %s1971_s0 = inlined_call_operand.vmem [shape: f32[16,32], index: 0, kind: input, shape index: {}]   ;;  %s1972_s1 = inlined_call_operand.vmem [shape: f32[16,32], index: 1, kind: input, shape index: {}]   ;;  %s1973_s2 = inlined_call_operand.vmem [shape: f32[3,4,32,8], index: 2, kind: input, shape index: {}]   ;;  %s1974_s3 = inlined_call_operand.vmem [shape: f32[3,4,1,8], index: 3, kind: input, shape index: {}]   ;;  %s1975_s4 = inlined_call_operand.vmem [shape: f32[4,8,32], index: 4, kind: input, shape index: {}]   ;;  %s1976_s5 = inlined_call_operand.vmem [shape: f32[5,32], index: 5, kind: input, shape index: {}]   ;;  %s1977_s6 = inlined_call_operand.hbm [shape: f32[16,32], index: 6, kind: output, shape index: {}]  }
   0x1   :  { %v24_v0 = vld [vmem:[%s1971_s0] sm:$0xff] }
   0x2   :  { %v34_v1 = vsel %vm33_vm0, %v24_v0, 0.0 }
   0x3   :  { %35 = vadd.xlane.f32.xlu0 %v34_v1 }
   0x4   :  { %11 = vsyncpa [#allocation3], 0  ;;  %v1556_v2 = vmov 32.0   ;;  %v1357_v14 = vld [vmem:[%s1973_s2 + $0x98] sm:$0xff]  ;;  %v1356_v15 = vld [vmem:[%s1973_s2 + $0x90] sm:$0xff]  ;;  %vm201_vm5 = vcmask 64512  }
   0x5   :  { %1487 = vrcp.f32 %v1556_v2  ;;  %156 = vmatpush.msra.mxu1 %v1357_v14  ;;  %v1355_v16 = vld [vmem:[%s1973_s2 + $0x88] sm:$0xff]  ;;  %v1354_v17 = vld [vmem:[%s1973_s2 + $0x80] sm:$0xff]  ;;  %v94_v20 = vld [vmem:[%s1973_s2 + $0x18] sm:$0xff]  ;;  %s1557_s16 = smov [#allocation2]   ;;  %s1340_s19 = sshll.u32 %s1977_s6, 4  ;;  %s1341_s19 = int_to_ptr.hbm [resolvable:$true] %s1340_s19 }
   0x6   :  { %v1618_v18 = vld [vmem:[%s1972_s1] sm:$0xff]  ;;  %v1625_v19 = vld [vmem:[%s1972_s1 + $0x8] sm:$0xff]  ;;  %v1377_v21 = vld [vmem:[%s1973_s2 + $0x38] sm:$0xff]  ;;  %117 = vmatpush.msra.mxu0 %v94_v20  ;;  %s1338_s17 = sshll.u32 %s1557_s16, 4  ;;  %s1559_s20 = smov 8   ;;  %s1339_s17 = int_to_ptr.vmem [resolvable:$true] %s1338_s17 }
   0x7   :  { %157 = vmatpush.msra.mxu1 %v1356_v15  ;;  %v93_v22 = vld [vmem:[%s1973_s2 + $0x10] sm:$0xff]  ;;  %v1644_v24 = vld [vmem:[%s1971_s0 + $0x8] sm:$0xff]  ;;  %v91_v28 = vld [vmem:[%s1973_s2] sm:$0xff] }
   0x8   :  { %v1376_v23 = vld [vmem:[%s1973_s2 + $0x30] sm:$0xff]  ;;  %118 = vmatpush.msra.mxu0 %v93_v22  ;;  %v37_v25 = vsel %vm33_vm0, %v1644_v24, 0.0  ;;  %v92_v26 = vld [vmem:[%s1973_s2 + $0x8] sm:$0xff]  ;;  %v1374_v29 = vld [vmem:[%s1973_s2 + $0x20] sm:$0xff] }
   0x9   :  { %158 = vmatpush.msra.mxu1 %v1355_v16  ;;  %v1375_v27 = vld [vmem:[%s1973_s2 + $0x28] sm:$0xff]  ;;  %38 = vadd.xlane.f32.xlu1 %v37_v25  ;;  %v1470_v39 = vld [vmem:[%s1976_s5] ss:$0 sm:$0xff]  ;;  %v1471_v42 = vld [vmem:[%s1976_s5 + $0x1] ss:$0 sm:$0xff] }
   0xa   :  { %119 = vmatpush.msra.mxu0 %v92_v26  ;;  %v1472_v49 = vld [vmem:[%s1974_s3 + $0x4] ss:$0 sm:$0xff]  ;;  %v1683_v53 = vld [vmem:[%s1974_s3] ss:$0 sm:$0xff]  ;;  %v1382_v14 = vld [vmem:[%s1973_s2 + $0xa8] sm:$0xff] }
   0xb   :  { %v1488_v3 = vpop.eup %1487  ;;  %159 = vmatpush.msra.mxu1 %v1354_v17  ;;  %v1381_v15 = vld [vmem:[%s1973_s2 + $0xa0] sm:$0xff] }
   0xc   :  { %v41_v4 = vmul.f32 32.0, %v1488_v3  ;;  %vm45_vm1 = vweird.f32 %v1488_v3  ;;  %1359 = vmatmul.msk.f32.vlgmr.msra.gmra.mxu1 %vm33_vm0, %v1618_v18  ;;  %120 = vmatpush.msra.mxu0 %v91_v28 }
   0xd   :  { %370 = vmatpush.msrb.mxu1 %v1377_v21 }
   0xe   :  { %v42_v5 = vsub.f32 1.0, %v41_v4 }
   0xf   :  { %371 = vmatpush.msrb.mxu1 %v1376_v23  ;;  %v1475_v23 = vld [vmem:[%s1974_s3 + $0x8] ss:$0 sm:$0xff] }
  0x10   :  { %v43_v6 = vmul.f32 %v1488_v3, %v42_v5 }
  0x11   :  { %372 = vmatpush.msrb.mxu1 %v1375_v27 }
  0x12   :  { %v44_v7 = vadd.f32 %v1488_v3, %v43_v6 }
  0x13   :  { %373 = vmatpush.msrb.mxu1 %v1374_v29 }
  0x14   :  { %v1599_v8 = vsel %vm45_vm1, %v1488_v3, %v44_v7  ;;  %1360 = vmatmul.msk.f32.gmra.mxu1 %vm33_vm0, %v1625_v19  ;;  %v1364_v7 = vld [vmem:[%s1973_s2 + $0x118] sm:$0xff] }
  0x15   :  { %189 = vmatpush.msra.mxu2 %v1364_v7 }
  0x76   :  { %v36_v9 = vpop.xlane.xlu0 %35 }
  0x77   :  { %v47_v10 = vmul.f32 %v1599_v8, %v36_v9  ;;  %v1363_v9 = vld [vmem:[%s1973_s2 + $0x110] sm:$0xff] }
  0x78   :  { %190 = vmatpush.msra.mxu2 %v1363_v9 }
  0x79   :  { %v49_v11 = vsub.f32 %v24_v0, %v47_v10  ;;  %v1362_v10 = vld [vmem:[%s1973_s2 + $0x108] sm:$0xff] }
  0x7a   :  { %191 = vmatpush.msra.mxu2 %v1362_v10 }
  0x7b   :  { %v51_v12 = vmul.f32 %v49_v11, %v49_v11 }
  0x7c   :  { %v39_v45 = vpop.xlane.xlu1 %38 }
  0x7d   :  { %v53_v13 = vsel %vm33_vm0, %v51_v12, 0.0  ;;  %v48_v46 = vmul.f32 %v1599_v8, %v39_v45  ;;  %v1384_v12 = vld [vmem:[%s1973_s2 + $0xb8] sm:$0xff] }
  0x7e   :  { %54 = vadd.xlane.f32.xlu0 %v53_v13  ;;  %v1383_v13 = vld [vmem:[%s1973_s2 + $0xb0] sm:$0xff] }
  0x7f   :  { %v50_v47 = vsub.f32 %v1644_v24, %v48_v46 }
  0x81   :  { %v52_v48 = vmul.f32 %v50_v47, %v50_v47 }
  0x83   :  { %v56_v50 = vsel %vm33_vm0, %v52_v48, 0.0  ;;  %v1390_v48 = vld [vmem:[%s1973_s2 + $0x130] sm:$0xff] }
  0x84   :  { %57 = vadd.xlane.f32.xlu1 %v56_v50 }
  0x89   :  { %v161_v51 = vpop.f32.mrf.mxu1 }
  0x8a   :  { %v162_v52 = vadd.f32 %v1472_v49, %v161_v51 }
  0x8c   :  { %1368 = vmatpush.xpose.msk.msra.mxu3 %vm201_vm5, %v162_v52  ;;  %v1388_v52 = vld [vmem:[%s1973_s2 + $0x120] sm:$0xff] }
  0x91   :  { %v164_v25 = vpop.f32.mrf.mxu1 }
  0x92   :  { %v165_v26 = vadd.f32 %v1472_v49, %v164_v25  ;;  %v1389_v49 = vld [vmem:[%s1973_s2 + $0x128] sm:$0xff] }
  0xf1   :  { %v55_v30 = vpop.xlane.xlu0 %54 }
  0xf2   :  { %v59_v31 = vmul.f32 %v55_v30, %v1599_v8 }
  0xf4   :  { %v61_v32 = vadd.f32 1e-05, %v59_v31 }
  0xf6   :  { %1489 = vrsqrt.f32 %v61_v32  ;;  %vm69_vm3 = vweird.f32 %v61_v32 }
  0xf7   :  { %v58_v56 = vpop.xlane.xlu1 %57 }
  0xf8   :  { %v60_v57 = vmul.f32 %v58_v56, %v1599_v8  ;;  %v1409_v56 = vld [vmem:[%s1973_s2 + $0x58] sm:$0xff] }
  0xfa   :  { %v62_v58 = vadd.f32 1e-05, %v60_v57  ;;  %v1408_v57 = vld [vmem:[%s1973_s2 + $0x50] sm:$0xff] }
  0xfc   :  { %v1490_v33 = vpop.eup %1489  ;;  %1491 = vrsqrt.f32 %v62_v58  ;;  %vm79_vm6 = vweird.f32 %v62_v58 }
  0xfd   :  { %v64_v34 = vmul.f32 %v1490_v33, %v61_v32  ;;  %vm70_vm2 = vweird.f32 %v1490_v33  ;;  %v1476_v32 = vld [vmem:[%s1974_s3 + $0x5] ss:$0 sm:$0xff] }
  0xfe   :  { %vm71_vm4 = vmor %vm69_vm3, %vm70_vm2 }
  0xff   :  { %v65_v35 = vmul.f32 %v1490_v33, %v64_v34 }
 0x101   :  { %v66_v36 = vmul.f32 0.5, %v65_v35 }
 0x102   :  { %v1492_v59 = vpop.eup %1491 }
 0x103   :  { %v67_v37 = vsub.f32 1.5, %v66_v36  ;;  %v74_v60 = vmul.f32 %v1492_v59, %v62_v58  ;;  %vm80_vm7 = vweird.f32 %v1492_v59 }
 0x104   :  { %vm81_vm8 = vmor %vm79_vm6, %vm80_vm7 }
 0x105   :  { %v68_v38 = vmul.f32 %v1490_v33, %v67_v37  ;;  %v75_v61 = vmul.f32 %v1492_v59, %v74_v60 }
 0x107   :  { %v72_v40 = vsel %vm71_vm4, %v1490_v33, %v68_v38  ;;  %v76_v62 = vmul.f32 0.5, %v75_v61  ;;  %v1474_v61 = vld [vmem:[%s1974_s3 + $0x1] ss:$0 sm:$0xff] }
 0x108   :  { %v83_v41 = vmul.f32 %v72_v40, %v49_v11  ;;  %v1361_v11 = vld [vmem:[%s1973_s2 + $0x100] sm:$0xff] }
 0x109   :  { %v77_v63 = vsub.f32 1.5, %v76_v62  ;;  %192 = vmatpush.msra.mxu2 %v1361_v11 }
 0x10a   :  { %v86_v43 = vmul.f32 %v1470_v39, %v83_v41  ;;  %1366 = vmatmul.msk.f32.vlgmr.msra.gmra.mxu2 %vm33_vm0, %v1618_v18 }
 0x10b   :  { %v78_v0 = vmul.f32 %v1492_v59, %v77_v63  ;;  %403 = vmatpush.msrb.mxu2 %v1384_v12  ;;  %v200_v63 = vld [vmem:[%s1975_s4] sm:$0xff] }
 0x10c   :  { %v1667_v44 = vadd.f32 %v1471_v42, %v86_v43 }
 0x10d   :  { %v82_v1 = vsel %vm81_vm8, %v1492_v59, %v78_v0  ;;  %404 = vmatpush.msrb.mxu2 %v1383_v13  ;;  %v1406_v59 = vld [vmem:[%s1973_s2 + $0x40] sm:$0xff] }
 0x10e   :  { %1352 = vmatmul.msk.f32.vlgmr.msra.gmra.mxu0 %vm33_vm0, %v1667_v44  ;;  %1379 = vmatmul.msk.f32.vlgmr.msrb.gmra.mxu1 %vm33_vm0, %v1667_v44  ;;  %v84_v2 = vmul.f32 %v82_v1, %v50_v47  ;;  %v1391_v47 = vld [vmem:[%s1973_s2 + $0x138] sm:$0xff] }
 0x10f   :  { %405 = vmatpush.msrb.mxu2 %v1382_v14 }
 0x110   :  { %v87_v3 = vmul.f32 %v1470_v39, %v84_v2 }
 0x111   :  { %406 = vmatpush.msrb.mxu2 %v1381_v15 }
 0x112   :  { %v1688_v4 = vadd.f32 %v1471_v42, %v87_v3  ;;  %1367 = vmatmul.msk.f32.gmra.mxu2 %vm33_vm0, %v1625_v19 }
 0x113   :  { %563 = vmatpush.msra.mxu2 %v200_v63 }
 0x116   :  { %1353 = vmatmul.msk.f32.gmra.mxu0 %vm33_vm0, %v1688_v4  ;;  %1380 = vmatmul.msk.f32.gmra.mxu1 %vm33_vm0, %v1688_v4 }
 0x11a   :  { %1386 = vmatmul.msk.f32.vlgmr.msrb.gmra.mxu2 %vm33_vm0, %v1618_v18 }
 0x11b   :  { %682 = vmatpush.msrb.mxu2 %v200_v63 }
 0x122   :  { %1387 = vmatmul.msk.f32.gmra.mxu2 %vm33_vm0, %v1625_v19 }
 0x18b   :  { %v122_v54 = vpop.f32.mrf.mxu0  ;;  %v375_v58 = vpop.f32.mrf.mxu1 }
 0x18c   :  { %v123_v55 = vadd.f32 %v1683_v53, %v122_v54 }
 0x18d   :  { %v194_v27 = vpop.f32.mrf.mxu2 }
 0x18e   :  { %1369 = vmatmul.msk.f32.vlgmr.msra.gmra.mxu3 %vm201_vm5, %v123_v55  ;;  %v195_v28 = vadd.f32 %v1475_v23, %v194_v27 }
 0x190   :  { %270 = vmatpush.msrb.mxu3 %v195_v28 }
 0x192   :  { %1371 = vmatpush.xpose.msk.msra.mxu3 %vm201_vm5, %v165_v26 }
 0x193   :  { %v125_v51 = vpop.f32.mrf.mxu0  ;;  %v378_v60 = vpop.f32.mrf.mxu1 }
 0x194   :  { %v126_v55 = vadd.f32 %v1683_v53, %v125_v51  ;;  %v1407_v53 = vld [vmem:[%s1973_s2 + $0x48] sm:$0xff]  ;;  %v379_v62 = vadd.f32 %v1474_v61, %v378_v60 }
 0x195   :  { %v197_v29 = vpop.f32.mrf.mxu2 }
 0x196   :  { %v198_v30 = vadd.f32 %v1475_v23, %v197_v29  ;;  %v1477_v23 = vld [vmem:[%s1974_s3 + $0x9] ss:$0 sm:$0xff] }
 0x198   :  { %343 = vmatpush.msrb.mxu0 %v198_v30 }
 0x19d   :  { %v408_v33 = vpop.f32.mrf.mxu2 }
 0x19e   :  { %v409_v34 = vadd.f32 %v1476_v32, %v408_v33 }
 0x1a0   :  { %1396 = vmatpush.xpose.msk.msra.mxu0 %vm201_vm5, %v409_v34 }
 0x1a5   :  { %v411_v50 = vpop.f32.mrf.mxu2 }
 0x1a6   :  { %v412_v54 = vadd.f32 %v1476_v32, %v411_v50  ;;  %v376_v32 = vadd.f32 %v1474_v61, %v375_v58 }
 0x211   :  { %v225_v5 = vpop.f32.mrf.mxu3 }
 0x212   :  { %v228_v6 = vsel %vm201_vm5, %v225_v5, -inf }
 0x213   :  { %229 = vmax.xlane.f32.xlu2 %v228_v6 }
 0x286   :  { %v230_v16 = vpop.xlane.xlu2 %229 }
 0x287   :  { %v231_v17 = vsub.f32 %v225_v5, %v230_v16 }
 0x289   :  { %v232_v20 = vmul.f32 1.442695, %v231_v17 }
 0x28b   :  { %1493 = vpow2.f32 %v232_v20 }
 0x291   :  { %v1494_v21 = vpop.eup %1493 }
 0x292   :  { %v234_v22 = vsel %vm201_vm5, %v1494_v21, 0.0 }
 0x293   :  { %235 = vadd.xlane.f32.xlu2 %v234_v22 }
 0x306   :  { %v236_v31 = vpop.xlane.xlu2 %235 }
 0x307   :  { %1495 = vrcp.f32 %v236_v31  ;;  %v248_v38 = vand.u32 2147483648, %v236_v31  ;;  %v246_v40 = vand.u32 2147483647, %v236_v31  ;;  %vm242_vm10 = vweird.f32 %v236_v31 }
 0x309   :  { %v249_v42 = vor.u32 1.1754944e-38, %v248_v38  ;;  %vm247_vm12 = vcmp.eq.f32.partialorder %v246_v40, 8.507059e+37 }
 0x30d   :  { %v1496_v35 = vpop.eup %1495 }
 0x30e   :  { %v238_v36 = vmul.f32 %v1496_v35, %v236_v31  ;;  %vm243_vm9 = vweird.f32 %v1496_v35 }
 0x30f   :  { %vm244_vm11 = vmor %vm242_vm10, %vm243_vm9 }
 0x310   :  { %v239_v37 = vsub.f32 1.0, %v238_v36 }
 0x312   :  { %v240_v39 = vmul.f32 %v1496_v35, %v239_v37 }
 0x314   :  { %v241_v41 = vadd.f32 %v1496_v35, %v240_v39 }
 0x316   :  { %v245_v43 = vsel %vm244_vm11, %v1496_v35, %v241_v41 }
 0x317   :  { %v250_v45 = vsel %vm247_vm12, %v249_v42, %v245_v43 }
 0x318   :  { %v251_v46 = vmul.f32 %v1494_v21, %v250_v45 }
 0x31a   :  { %1370 = vmatmul.msk.f32.vlgmr.msrb.gmra.mxu3 %vm201_vm5, %v251_v46 }
 0x31b   :  { %436 = vmatpush.msrb.mxu3 %v1391_v47 }
 0x31d   :  { %437 = vmatpush.msrb.mxu3 %v1390_v48 }
 0x31f   :  { %438 = vmatpush.msrb.mxu3 %v1389_v49 }
 0x321   :  { %439 = vmatpush.msrb.mxu3 %v1388_v52 }
 0x322   :  { %1372 = vmatmul.msk.f32.vlgmr.msra.gmra.mxu3 %vm201_vm5, %v126_v55 }
 0x323   :  { %1401 = vmatpush.xpose.msk.msra.mxu3 %vm201_vm5, %v412_v54 }
 0x32a   :  { %1393 = vmatmul.msk.f32.vlgmr.msrb.gmra.mxu3 %vm33_vm0, %v1618_v18 }
 0x32b   :  { %709 = vmatpush.msrb.mxu3 %v1409_v56 }
 0x32d   :  { %710 = vmatpush.msrb.mxu3 %v1408_v57 }
 0x32f   :  { %711 = vmatpush.msrb.mxu3 %v1407_v53 }
 0x331   :  { %712 = vmatpush.msrb.mxu3 %v1406_v59 }
 0x332   :  { %1394 = vmatmul.msk.f32.gmra.mxu3 %vm33_vm0, %v1625_v19 }
 0x33a   :  { %1402 = vmatmul.msk.f32.vlgmr.msra.gmra.mxu3 %vm201_vm5, %v379_v62 }
 0x342   :  { %1411 = vmatmul.msk.f32.vlgmr.msrb.gmra.mxu3 %vm33_vm0, %v1667_v44 }
 0x34a   :  { %1412 = vmatmul.msk.f32.gmra.mxu3 %vm33_vm0, %v1688_v4 }
 0x39d   :  { %v272_v0 = vpop.f32.mrf.mxu3 }
 0x39e   :  { %1400 = vmatmul.msk.f32.vlgmr.msra.gmra.mxu2 %vm201_vm5, %v272_v0 }
 0x3a5   :  { %v298_v1 = vpop.f32.mrf.mxu3 }
 0x3a6   :  { %v301_v2 = vsel %vm201_vm5, %v298_v1, -inf }
 0x3a7   :  { %302 = vmax.xlane.f32.xlu0 %v301_v2 }
 0x3ad   :  { %v441_v3 = vpop.f32.mrf.mxu3 }
 0x3ae   :  { %v442_v28 = vadd.f32 %v1477_v23, %v441_v3  ;;  %v1416_v3 = vld [vmem:[%s1973_s2 + $0xd8] sm:$0xff] }
 0x3b5   :  { %v444_v5 = vpop.f32.mrf.mxu3 }
 0x3b6   :  { %v445_v31 = vadd.f32 %v1477_v23, %v444_v5 }
 0x3bd   :  { %v591_v6 = vpop.f32.mrf.mxu3 }
 0x3be   :  { %v594_v7 = vsel %vm201_vm5, %v591_v6, -inf }
 0x3bf   :  { %595 = vmax.xlane.f32.xlu0 %v594_v7 }
 0x41a   :  { %v303_v9 = vpop.xlane.xlu0 %302 }
 0x41b   :  { %v304_v10 = vsub.f32 %v298_v1, %v303_v9  ;;  %v1414_v9 = vld [vmem:[%s1973_s2 + $0xc8] sm:$0xff] }
 0x41d   :  { %v305_v11 = vmul.f32 1.442695, %v304_v10 }
 0x41f   :  { %1497 = vpow2.f32 %v305_v11  ;;  %v1413_v11 = vld [vmem:[%s1973_s2 + $0xc0] sm:$0xff] }
 0x425   :  { %v1498_v12 = vpop.eup %1497 }
 0x426   :  { %v307_v13 = vsel %vm201_vm5, %v1498_v12, 0.0 }
 0x427   :  { %308 = vadd.xlane.f32.xlu1 %v307_v13  ;;  %v1395_v13 = vld [vmem:[%s1975_s4 + $0x8] sm:$0xff] }
 0x428   :  { %540 = vmatpush.msra.mxu1 %v1395_v13 }
 0x42a   :  { %659 = vmatpush.msrb.mxu1 %v1395_v13 }
 0x432   :  { %v596_v33 = vpop.xlane.xlu0 %595 }
 0x433   :  { %v597_v34 = vsub.f32 %v591_v6, %v596_v33  ;;  %v1415_v6 = vld [vmem:[%s1973_s2 + $0xd0] sm:$0xff] }
 0x435   :  { %v598_v36 = vmul.f32 1.442695, %v597_v34 }
 0x49a   :  { %v309_v14 = vpop.xlane.xlu1 %308 }
 0x49b   :  { %1499 = vrcp.f32 %v309_v14  ;;  %v321_v20 = vand.u32 2147483648, %v309_v14  ;;  %v319_v22 = vand.u32 2147483647, %v309_v14  ;;  %vm315_vm14 = vweird.f32 %v309_v14 }
 0x49c   :  { %1501 = vpow2.f32 %v598_v36  ;;  %v1422_v36 = vld [vmem:[%s1973_s2 + $0x150] sm:$0xff] }
 0x49d   :  { %v322_v26 = vor.u32 1.1754944e-38, %v321_v20  ;;  %vm320_vm1 = vcmp.eq.f32.partialorder %v319_v22, 8.507059e+37  ;;  %v1478_v20 = vld [vmem:[%s1974_s3 + $0x2] ss:$0 sm:$0xff] }
 0x4a1   :  { %v1500_v15 = vpop.eup %1499 }
 0x4a2   :  { %v311_v16 = vmul.f32 %v1500_v15, %v309_v14  ;;  %vm316_vm13 = vweird.f32 %v1500_v15  ;;  %v1502_v39 = vpop.eup %1501 }
 0x4a3   :  { %vm317_vm15 = vmor %vm315_vm14, %vm316_vm13  ;;  %v600_v40 = vsel %vm201_vm5, %v1502_v39, 0.0 }
 0x4a4   :  { %v312_v17 = vsub.f32 1.0, %v311_v16  ;;  %v1479_v16 = vld [vmem:[%s1974_s3 + $0x6] ss:$0 sm:$0xff] }
 0x4a6   :  { %v313_v21 = vmul.f32 %v1500_v15, %v312_v17  ;;  %v714_v17 = vpop.f32.mrf.mxu3 }
 0x4a7   :  { %v715_v23 = vadd.f32 %v1478_v20, %v714_v17 }
 0x4a8   :  { %v314_v25 = vadd.f32 %v1500_v15, %v313_v21 }
 0x4aa   :  { %v318_v27 = vsel %vm317_vm15, %v1500_v15, %v314_v25 }
 0x4ab   :  { %v323_v29 = vsel %vm320_vm1, %v322_v26, %v318_v27 }
 0x4ac   :  { %v324_v30 = vmul.f32 %v1498_v12, %v323_v29  ;;  %v1825_v29 = vpop.f32.mrf.mxu2 }
 0x4ae   :  { %1373 = vmatmul.msk.f32.vlgmr.msrb.gmra.mxu0 %vm201_vm5, %v324_v30  ;;  %v717_v26 = vpop.f32.mrf.mxu3 }
 0x4af   :  { %517 = vmatpush.msrb.mxu0 %v442_v28  ;;  %v718_v28 = vadd.f32 %v1478_v20, %v717_v26  ;;  %v1438_v26 = vld [vmem:[%s1973_s2 + $0x70] sm:$0xff] }
 0x4b6   :  { %1397 = vmatmul.msk.f32.vlgmr.msra.gmra.mxu0 %vm201_vm5, %v376_v32 }
 0x4b7   :  { %636 = vmatpush.msra.mxu0 %v445_v31 }
 0x52b   :  { %v345_v35 = vpop.f32.mrf.mxu0 }
 0x52c   :  { %1405 = vmatmul.msk.f32.vlgmr.msrb.gmra.mxu2 %vm201_vm5, %v345_v35  ;;  %v1423_v35 = vld [vmem:[%s1973_s2 + $0x158] sm:$0xff] }
 0x533   :  { %v472_v37 = vpop.f32.mrf.mxu0 }
 0x534   :  { %v475_v38 = vsel %vm201_vm5, %v472_v37, -inf }
 0x535   :  { %476 = vmax.xlane.f32.xlu2 %v475_v38  ;;  %v1420_v38 = vld [vmem:[%s1973_s2 + $0x140] sm:$0xff] }
 0x53d   :  { %601 = vadd.xlane.f32.xlu2 %v600_v40 }
 0x5a8   :  { %v477_v41 = vpop.xlane.xlu2 %476 }
 0x5a9   :  { %v478_v42 = vsub.f32 %v472_v37, %v477_v41  ;;  %v1421_v37 = vld [vmem:[%s1973_s2 + $0x148] sm:$0xff] }
 0x5ab   :  { %v479_v43 = vmul.f32 1.442695, %v478_v42 }
 0x5ad   :  { %1503 = vpow2.f32 %v479_v43 }
 0x5af   :  { %v1827_v30 = vpop.f32.mrf.mxu2 }
 0x5b0   :  { %v602_v47 = vpop.xlane.xlu2 %601 }
 0x5b1   :  { %1505 = vrcp.f32 %v602_v47  ;;  %v614_v63 = vand.u32 2147483648, %v602_v47  ;;  %vm608_vm8 = vweird.f32 %v602_v47  ;;  %v612_v1 = vand.u32 2147483647, %v602_v47 }
 0x5b3   :  { %v1504_v45 = vpop.eup %1503  ;;  %v615_v7 = vor.u32 1.1754944e-38, %v614_v63  ;;  %vm613_vm10 = vcmp.eq.f32.partialorder %v612_v1, 8.507059e+37 }
 0x5b4   :  { %v481_v46 = vsel %vm201_vm5, %v1504_v45, 0.0 }
 0x5b5   :  { %482 = vadd.xlane.f32.xlu1 %v481_v46 }
 0x5b7   :  { %v1506_v49 = vpop.eup %1505 }
 0x5b8   :  { %v604_v50 = vmul.f32 %v1506_v49, %v602_v47  ;;  %vm609_vm6 = vweird.f32 %v1506_v49 }
 0x5b9   :  { %vm610_vm9 = vmor %vm608_vm8, %vm609_vm6 }
 0x5ba   :  { %v605_v52 = vsub.f32 1.0, %v604_v50 }
 0x5bc   :  { %v606_v57 = vmul.f32 %v1506_v49, %v605_v52 }
 0x5be   :  { %v607_v61 = vadd.f32 %v1506_v49, %v606_v57 }
 0x5c0   :  { %v611_v5 = vsel %vm610_vm9, %v1506_v49, %v607_v61 }
 0x5c1   :  { %v616_v10 = vsel %vm613_vm10, %v615_v7, %v611_v5 }
 0x5c2   :  { %v617_v12 = vmul.f32 %v1502_v39, %v616_v10 }
 0x628   :  { %v483_v48 = vpop.xlane.xlu1 %482 }
 0x629   :  { %1507 = vrcp.f32 %v483_v48  ;;  %v495_v56 = vand.u32 2147483648, %v483_v48  ;;  %v493_v58 = vand.u32 2147483647, %v483_v48  ;;  %vm489_vm3 = vweird.f32 %v483_v48 }
 0x62b   :  { %v496_v60 = vor.u32 1.1754944e-38, %v495_v56  ;;  %vm494_vm7 = vcmp.eq.f32.partialorder %v493_v58, 8.507059e+37 }
 0x62f   :  { %v1508_v51 = vpop.eup %1507 }
 0x630   :  { %v485_v54 = vmul.f32 %v1508_v51, %v483_v48  ;;  %vm490_vm2 = vweird.f32 %v1508_v51 }
 0x631   :  { %vm491_vm4 = vmor %vm489_vm3, %vm490_vm2 }
 0x632   :  { %v486_v55 = vsub.f32 1.0, %v485_v54  ;;  %v1480_v54 = vld [vmem:[%s1974_s3 + $0xa] ss:$0 sm:$0xff] }
 0x634   :  { %v487_v53 = vmul.f32 %v1508_v51, %v486_v55 }
 0x636   :  { %v488_v59 = vadd.f32 %v1508_v51, %v487_v53  ;;  %v1427_v53 = vld [vmem:[%s1975_s4 + $0x10] sm:$0xff] }
 0x637   :  { %879 = vmatpush.msra.mxu3 %v1427_v53 }
 0x638   :  { %v492_v62 = vsel %vm491_vm4, %v1508_v51, %v488_v59 }
 0x639   :  { %v497_v0 = vsel %vm494_vm7, %v496_v60, %v492_v62 }
 0x63a   :  { %v498_v2 = vmul.f32 %v1504_v45, %v497_v0 }
 0x63c   :  { %1398 = vmatmul.msk.f32.vlgmr.msrb.gmra.mxu0 %vm201_vm5, %v498_v2 }
 0x63d   :  { %742 = vmatpush.msrb.mxu0 %v1416_v3 }
 0x63f   :  { %743 = vmatpush.msrb.mxu0 %v1415_v6 }
 0x641   :  { %744 = vmatpush.msrb.mxu0 %v1414_v9 }
 0x643   :  { %745 = vmatpush.msrb.mxu0 %v1413_v11 }
 0x644   :  { %1403 = vmatmul.msk.f32.vlgmr.msra.gmra.mxu0 %vm201_vm5, %v617_v12 }
 0x64c   :  { %1418 = vmatmul.msk.f32.vlgmr.msrb.gmra.mxu0 %vm33_vm0, %v1618_v18 }
 0x654   :  { %1419 = vmatmul.msk.f32.gmra.mxu0 %vm33_vm0, %v1625_v19 }
 0x6b9   :  { %v519_v14 = vpop.f32.mrf.mxu0 }
 0x6ba   :  { %1399 = vmatmul.msk.f32.vlgmr.msra.gmra.mxu1 %vm201_vm5, %v519_v14 }
 0x6bb   :  { %775 = vmatpush.msra.mxu1 %v1423_v35  ;;  %v1481_v35 = vld [vmem:[%s1974_s3 + $0x7] ss:$0 sm:$0xff] }
 0x6bd   :  { %776 = vmatpush.msra.mxu1 %v1422_v36 }
 0x6bf   :  { %777 = vmatpush.msra.mxu1 %v1421_v37 }
 0x6c1   :  { %v638_v15 = vpop.f32.mrf.mxu0  ;;  %778 = vmatpush.msra.mxu1 %v1420_v38 }
 0x6c2   :  { %1404 = vmatmul.msk.f32.vlgmr.msrb.gmra.mxu1 %vm201_vm5, %v638_v15 }
 0x6c9   :  { %v747_v21 = vpop.f32.mrf.mxu0 }
 0x6ca   :  { %v748_v22 = vadd.f32 %v1479_v16, %v747_v21  ;;  %1425 = vmatmul.msk.f32.vlgmr.msra.gmra.mxu1 %vm33_vm0, %v1618_v18 }
 0x6cc   :  { %1428 = vmatpush.xpose.msk.msra.mxu2 %vm201_vm5, %v748_v22  ;;  %v1446_v22 = vld [vmem:[%s1973_s2 + $0xf8] sm:$0xff] }
 0x6cf   :  { %1429 = vmatmul.msk.f32.vlgmr.msra.gmra.mxu2 %vm201_vm5, %v715_v23  ;;  %v1439_v23 = vld [vmem:[%s1973_s2 + $0x78] sm:$0xff] }
 0x6d0   :  { %1004 = vmatpush.msrb.mxu3 %v1439_v23 }
 0x6d1   :  { %v750_v25 = vpop.f32.mrf.mxu0 }
 0x6d2   :  { %v751_v27 = vadd.f32 %v1479_v16, %v750_v25  ;;  %1426 = vmatmul.msk.f32.gmra.mxu1 %vm33_vm0, %v1625_v19  ;;  %v1445_v25 = vld [vmem:[%s1973_s2 + $0xf0] sm:$0xff]  ;;  %1005 = vmatpush.msrb.mxu3 %v1438_v26 }
 0x6d4   :  { %1432 = vmatpush.xpose.msk.msra.mxu0 %vm201_vm5, %v751_v27  ;;  %v1444_v27 = vld [vmem:[%s1973_s2 + $0xe8] sm:$0xff] }
 0x6d7   :  { %1433 = vmatmul.msk.f32.vlgmr.msra.gmra.mxu0 %vm201_vm5, %v718_v28  ;;  %v1437_v28 = vld [vmem:[%s1973_s2 + $0x68] sm:$0xff] }
 0x6d8   :  { %1037 = vmatpush.msrb.mxu0 %v1446_v22  ;;  %1006 = vmatpush.msrb.mxu3 %v1437_v28 }
 0x6da   :  { %1038 = vmatpush.msrb.mxu0 %v1445_v25 }
 0x6dc   :  { %1039 = vmatpush.msrb.mxu0 %v1444_v27 }
 0x737   :  { %v1849_v50 = vpop.f32.mrf.mxu1 }
 0x73f   :  { %v1851_v51 = vpop.f32.mrf.mxu1 }
 0x747   :  { %v780_v52 = vpop.f32.mrf.mxu1 }
 0x748   :  { %v781_v55 = vadd.f32 %v1480_v54, %v780_v52 }
 0x74a   :  { %856 = vmatpush.msrb.mxu2 %v781_v55  ;;  %v1451_v55 = vld [vmem:[%s1973_s2 + $0x168] sm:$0xff] }
 0x74c   :  { %976 = vmatpush.msra.mxu2 %v1427_v53 }
 0x74f   :  { %v783_v56 = vpop.f32.mrf.mxu1 }
 0x750   :  { %v784_v57 = vadd.f32 %v1480_v54, %v783_v56  ;;  %v1452_v54 = vld [vmem:[%s1973_s2 + $0x170] sm:$0xff]  ;;  %v1450_v56 = vld [vmem:[%s1973_s2 + $0x160] sm:$0xff] }
 0x752   :  { %v811_v31 = vpop.f32.mrf.mxu2  ;;  %953 = vmatpush.msrb.mxu1 %v784_v57 }
 0x753   :  { %v814_v32 = vsel %vm201_vm5, %v811_v31, -inf }
 0x754   :  { %v908_v33 = vpop.f32.mrf.mxu0  ;;  %815 = vmax.xlane.f32.xlu0 %v814_v32  ;;  %v1436_v32 = vld [vmem:[%s1973_s2 + $0x60] sm:$0xff] }
 0x755   :  { %v911_v34 = vsel %vm201_vm5, %v908_v33, -inf  ;;  %1007 = vmatpush.msrb.mxu3 %v1436_v32 }
 0x756   :  { %912 = vmax.xlane.f32.xlu2 %v911_v34 }
 0x7c7   :  { %v816_v39 = vpop.xlane.xlu0 %815 }
 0x7c8   :  { %v817_v40 = vsub.f32 %v811_v31, %v816_v39  ;;  %v1443_v31 = vld [vmem:[%s1973_s2 + $0xe0] sm:$0xff] }
 0x7c9   :  { %v913_v41 = vpop.xlane.xlu2 %912  ;;  %1040 = vmatpush.msrb.mxu0 %v1443_v31 }
 0x7ca   :  { %v818_v42 = vmul.f32 1.442695, %v817_v40  ;;  %v914_v43 = vsub.f32 %v908_v33, %v913_v41  ;;  %1448 = vmatmul.msk.f32.vlgmr.msrb.gmra.mxu0 %vm33_vm0, %v1618_v18  ;;  %v566_v40 = vadd.f32 %v1825_v29, %v1849_v50 }
 0x7cc   :  { %1509 = vpow2.f32 %v818_v42  ;;  %v915_v45 = vmul.f32 1.442695, %v914_v43 }
 0x7ce   :  { %1511 = vpow2.f32 %v915_v45 }
 0x7d2   :  { %v1510_v46 = vpop.eup %1509  ;;  %1449 = vmatmul.msk.f32.gmra.mxu0 %vm33_vm0, %v1625_v19 }
 0x7d3   :  { %v820_v47 = vsel %vm201_vm5, %v1510_v46, 0.0 }
 0x7d4   :  { %v1512_v48 = vpop.eup %1511  ;;  %821 = vadd.xlane.f32.xlu1 %v820_v47  ;;  %v1453_v47 = vld [vmem:[%s1973_s2 + $0x178] sm:$0xff] }
 0x7d5   :  { %v917_v49 = vsel %vm201_vm5, %v1512_v48, 0.0  ;;  %1070 = vmatpush.msra.mxu1 %v1453_v47 }
 0x7d6   :  { %918 = vadd.xlane.f32.xlu0 %v917_v49 }
 0x7d7   :  { %1071 = vmatpush.msra.mxu1 %v1452_v54 }
 0x7d9   :  { %1072 = vmatpush.msra.mxu1 %v1451_v55 }
 0x7db   :  { %1073 = vmatpush.msra.mxu1 %v1450_v56 }
 0x847   :  { %v822_v58 = vpop.xlane.xlu1 %821  ;;  %v1042_v36 = vpop.f32.mrf.mxu0 }
 0x848   :  { %1513 = vrcp.f32 %v822_v58  ;;  %v834_v1 = vand.u32 2147483648, %v822_v58  ;;  %v832_v3 = vand.u32 2147483647, %v822_v58  ;;  %vm828_vm12 = vweird.f32 %v822_v58 }
 0x849   :  { %v919_v59 = vpop.xlane.xlu0 %918  ;;  %v1043_v37 = vadd.f32 %v1481_v35, %v1042_v36 }
 0x84a   :  { %1515 = vrcp.f32 %v919_v59  ;;  %v931_v6 = vand.u32 2147483648, %v919_v59  ;;  %v929_v10 = vand.u32 2147483647, %v919_v59  ;;  %v835_v11 = vor.u32 1.1754944e-38, %v834_v1 }
 0x84b   :  { %vm833_vm15 = vcmp.eq.f32.partialorder %v832_v3, 8.507059e+37  ;;  %vm925_vm1 = vweird.f32 %v919_v59 }
 0x84c   :  { %v932_v15 = vor.u32 1.1754944e-38, %v931_v6  ;;  %vm930_vm3 = vcmp.eq.f32.partialorder %v929_v10, 8.507059e+37  ;;  %v1457_v6 = vld [vmem:[%s1975_s4 + $0x18] sm:$0xff] }
 0x84e   :  { %v1514_v60 = vpop.eup %1513 }
 0x84f   :  { %v824_v61 = vmul.f32 %v1514_v60, %v822_v58  ;;  %vm829_vm11 = vweird.f32 %v1514_v60  ;;  %v1045_v38 = vpop.f32.mrf.mxu0 }
 0x850   :  { %v1516_v62 = vpop.eup %1515  ;;  %vm830_vm14 = vmor %vm828_vm12, %vm829_vm11  ;;  %v1046_v39 = vadd.f32 %v1481_v35, %v1045_v38 }
 0x851   :  { %v825_v63 = vsub.f32 1.0, %v824_v61  ;;  %v921_v0 = vmul.f32 %v1516_v62, %v919_v59  ;;  %vm926_vm13 = vweird.f32 %v1516_v62 }
 0x852   :  { %vm927_vm2 = vmor %vm925_vm1, %vm926_vm13  ;;  %1462 = vmatpush.xpose.msk.msra.mxu0 %vm201_vm5, %v1046_v39  ;;  %v685_v39 = vadd.f32 %v1827_v30, %v1851_v51  ;;  %v1529_v30 = vld [vmem:[%s1971_s0] sm:$0xff] }
 0x853   :  { %v826_v2 = vmul.f32 %v1514_v60, %v825_v63  ;;  %v922_v5 = vsub.f32 1.0, %v921_v0 }
 0x855   :  { %v827_v7 = vadd.f32 %v1514_v60, %v826_v2  ;;  %v923_v9 = vmul.f32 %v1516_v62, %v922_v5 }
 0x857   :  { %v831_v12 = vsel %vm830_vm14, %v1514_v60, %v827_v7  ;;  %v924_v13 = vadd.f32 %v1516_v62, %v923_v9 }
 0x858   :  { %v836_v14 = vsel %vm833_vm15, %v835_v11, %v831_v12 }
 0x859   :  { %v928_v16 = vsel %vm927_vm2, %v1516_v62, %v924_v13  ;;  %v837_v17 = vmul.f32 %v1510_v46, %v836_v14 }
 0x85a   :  { %v933_v20 = vsel %vm930_vm3, %v932_v15, %v928_v16 }
 0x85b   :  { %1430 = vmatmul.msk.f32.vlgmr.msrb.gmra.mxu2 %vm201_vm5, %v837_v17  ;;  %v934_v21 = vmul.f32 %v1512_v48, %v933_v20 }
 0x85c   :  { %1458 = vmatpush.xpose.msk.msrb.mxu2 %vm201_vm5, %v1043_v37 }
 0x85d   :  { %1434 = vmatmul.msk.f32.vlgmr.msrb.gmra.mxu1 %vm201_vm5, %v934_v21 }
 0x865   :  { %1455 = vmatmul.msk.f32.vlgmr.msra.gmra.mxu1 %vm33_vm0, %v1618_v18 }
 0x86d   :  { %1456 = vmatmul.msk.f32.gmra.mxu1 %vm33_vm0, %v1625_v19  ;;  %v1483_v19 = vld [vmem:[%s1974_s3 + $0xb] ss:$0 sm:$0xff] }
 0x8da   :  { %v955_v33 = vpop.f32.mrf.mxu1 }
 0x8db   :  { %1435 = vmatmul.msk.f32.vlgmr.msra.gmra.mxu2 %vm201_vm5, %v955_v33 }
 0x8de   :  { %v858_v34 = vpop.f32.mrf.mxu2 }
 0x8df   :  { %1431 = vmatmul.msk.f32.vlgmr.msra.gmra.mxu3 %vm201_vm5, %v858_v34 }
 0x8e0   :  { %1174 = vmatpush.msra.mxu3 %v1457_v6 }
 0x8e2   :  { %v1075_v18 = vpop.f32.mrf.mxu1 }
 0x8e3   :  { %v1076_v2 = vadd.f32 %v1483_v19, %v1075_v18 }
 0x8e5   :  { %1151 = vmatpush.msra.mxu2 %v1076_v2 }
 0x8e7   :  { %1441 = vmatmul.msk.f32.vlgmr.msrb.gmra.mxu3 %vm33_vm0, %v1667_v44 }
 0x8ea   :  { %v1078_v3 = vpop.f32.mrf.mxu1 }
 0x8eb   :  { %v1079_v5 = vadd.f32 %v1483_v19, %v1078_v3 }
 0x8ed   :  { %1248 = vmatpush.msrb.mxu1 %v1079_v5 }
 0x8ef   :  { %1442 = vmatmul.msk.f32.gmra.mxu3 %vm33_vm0, %v1688_v4  ;;  %v1482_v4 = vld [vmem:[%s1974_s3 + $0x3] ss:$0 sm:$0xff] }
 0x95e   :  { %v1912_v29 = vpop.f32.mrf.mxu2 }
 0x962   :  { %v881_v41 = vpop.f32.mrf.mxu3 }
 0x963   :  { %v1902_v44 = vadd.f32 %v881_v41, %v566_v40  ;;  %v981_v40 = vadd.f32 %v1912_v29, %v685_v39  ;;  %v1484_v41 = vld [vmem:[%s1976_s5 + $0x4] ss:$0 sm:$0xff] }
 0x96a   :  { %v1009_v42 = vpop.f32.mrf.mxu3 }
 0x96b   :  { %v1010_v43 = vadd.f32 %v1482_v4, %v1009_v42 }
 0x96d   :  { %1459 = vmatmul.msk.f32.vlgmr.msrb.gmra.mxu2 %vm201_vm5, %v1010_v43 }
 0x96e   :  { %1271 = vmatpush.msrb.mxu2 %v1457_v6 }
 0x972   :  { %v1012_v45 = vpop.f32.mrf.mxu3 }
 0x973   :  { %v1013_v46 = vadd.f32 %v1482_v4, %v1012_v45 }
 0x975   :  { %1463 = vmatmul.msk.f32.vlgmr.msra.gmra.mxu0 %vm201_vm5, %v1013_v46 }
 0x9f0   :  { %v1106_v48 = vpop.f32.mrf.mxu2 }
 0x9f1   :  { %v1109_v49 = vsel %vm201_vm5, %v1106_v48, -inf }
 0x9f2   :  { %v1203_v50 = vpop.f32.mrf.mxu0  ;;  %1110 = vmax.xlane.f32.xlu1 %v1109_v49 }
 0x9f3   :  { %v1206_v52 = vsel %vm201_vm5, %v1203_v50, -inf }
 0x9f4   :  { %1207 = vmax.xlane.f32.xlu2 %v1206_v52 }
 0xa65   :  { %v1111_v57 = vpop.xlane.xlu1 %1110 }
 0xa66   :  { %v1112_v53 = vsub.f32 %v1106_v48, %v1111_v57 }
 0xa67   :  { %v1208_v58 = vpop.xlane.xlu2 %1207 }
 0xa68   :  { %v1113_v59 = vmul.f32 1.442695, %v1112_v53  ;;  %v1209_v60 = vsub.f32 %v1203_v50, %v1208_v58 }
 0xa6a   :  { %1517 = vpow2.f32 %v1113_v59  ;;  %v1210_v61 = vmul.f32 1.442695, %v1209_v60 }
 0xa6c   :  { %1519 = vpow2.f32 %v1210_v61 }
 0xa70   :  { %v1518_v62 = vpop.eup %1517 }
 0xa71   :  { %v1115_v63 = vsel %vm201_vm5, %v1518_v62, 0.0 }
 0xa72   :  { %v1520_v0 = vpop.eup %1519  ;;  %1116 = vadd.xlane.f32.xlu0 %v1115_v63 }
 0xa73   :  { %v1212_v1 = vsel %vm201_vm5, %v1520_v0, 0.0 }
 0xa74   :  { %1213 = vadd.xlane.f32.xlu1 %v1212_v1 }
 0xae5   :  { %v1117_v7 = vpop.xlane.xlu0 %1116 }
 0xae6   :  { %1521 = vrcp.f32 %v1117_v7  ;;  %v1129_v15 = vand.u32 2147483648, %v1117_v7  ;;  %v1127_v17 = vand.u32 2147483647, %v1117_v7  ;;  %vm1123_vm6 = vweird.f32 %v1117_v7 }
 0xae7   :  { %v1214_v9 = vpop.xlane.xlu1 %1213 }
 0xae8   :  { %1523 = vrcp.f32 %v1214_v9  ;;  %v1226_v21 = vand.u32 2147483648, %v1214_v9  ;;  %v1224_v25 = vand.u32 2147483647, %v1214_v9  ;;  %v1130_v26 = vor.u32 1.1754944e-38, %v1129_v15 }
 0xae9   :  { %vm1128_vm9 = vcmp.eq.f32.partialorder %v1127_v17, 8.507059e+37  ;;  %vm1220_vm10 = vweird.f32 %v1214_v9 }
 0xaea   :  { %v1227_v32 = vor.u32 1.1754944e-38, %v1226_v21  ;;  %vm1225_vm12 = vcmp.eq.f32.partialorder %v1224_v25, 8.507059e+37 }
 0xaec   :  { %v1522_v10 = vpop.eup %1521 }
 0xaed   :  { %v1119_v11 = vmul.f32 %v1522_v10, %v1117_v7  ;;  %vm1124_vm4 = vweird.f32 %v1522_v10 }
 0xaee   :  { %v1524_v12 = vpop.eup %1523  ;;  %vm1125_vm8 = vmor %vm1123_vm6, %vm1124_vm4 }
 0xaef   :  { %v1120_v13 = vsub.f32 1.0, %v1119_v11  ;;  %v1216_v14 = vmul.f32 %v1524_v12, %v1214_v9  ;;  %vm1221_vm7 = vweird.f32 %v1524_v12  ;;  %v1485_v11 = vld [vmem:[%s1976_s5 + $0x2] ss:$0 sm:$0xff] }
 0xaf0   :  { %vm1222_vm11 = vmor %vm1220_vm10, %vm1221_vm7 }
 0xaf1   :  { %v1121_v16 = vmul.f32 %v1522_v10, %v1120_v13  ;;  %v1217_v20 = vsub.f32 1.0, %v1216_v14  ;;  %v1486_v14 = vld [vmem:[%s1976_s5 + $0x3] ss:$0 sm:$0xff]  ;;  %s1558_s5 = smov 128  }
 0xaf3   :  { %v1122_v22 = vadd.f32 %v1522_v10, %v1121_v16  ;;  %v1218_v23 = vmul.f32 %v1524_v12, %v1217_v20 }
 0xaf5   :  { %v1126_v27 = vsel %vm1125_vm8, %v1522_v10, %v1122_v22  ;;  %v1219_v28 = vadd.f32 %v1524_v12, %v1218_v23 }
 0xaf6   :  { %v1131_v31 = vsel %vm1128_vm9, %v1130_v26, %v1126_v27 }
 0xaf7   :  { %v1223_v33 = vsel %vm1222_vm11, %v1524_v12, %v1219_v28  ;;  %v1132_v34 = vmul.f32 %v1518_v62, %v1131_v31 }
 0xaf8   :  { %v1228_v35 = vsel %vm1225_vm12, %v1227_v32, %v1223_v33 }
 0xaf9   :  { %1460 = vmatmul.msk.f32.vlgmr.msra.gmra.mxu2 %vm201_vm5, %v1132_v34  ;;  %v1229_v36 = vmul.f32 %v1520_v0, %v1228_v35 }
 0xafb   :  { %1464 = vmatmul.msk.f32.vlgmr.msrb.gmra.mxu1 %vm201_vm5, %v1229_v36 }
 0xb78   :  { %v1250_v37 = vpop.f32.mrf.mxu1 }
 0xb79   :  { %1465 = vmatmul.msk.f32.vlgmr.msrb.gmra.mxu2 %vm201_vm5, %v1250_v37 }
 0xb7c   :  { %v1153_v38 = vpop.f32.mrf.mxu2 }
 0xb7d   :  { %1461 = vmatmul.msk.f32.vlgmr.msra.gmra.mxu3 %vm201_vm5, %v1153_v38 }
 0xbfc   :  { %v1273_v4 = vpop.f32.mrf.mxu2 }
 0xbfd   :  { %v1276_v42 = vadd.f32 %v1273_v4, %v981_v40 }
 0xbff   :  { %v1279_v43 = vadd.f32 %v1484_v41, %v1276_v42 }
 0xc00   :  { %v1176_v45 = vpop.f32.mrf.mxu3 }
 0xc01   :  { %v1179_v46 = vadd.f32 %v1176_v45, %v1902_v44  ;;  %v1281_v47 = vadd.f32 %v1279_v43, %v1644_v24 }
 0xc03   :  { %v1278_v48 = vadd.f32 %v1484_v41, %v1179_v46  ;;  %v1285_v49 = vsel %vm33_vm0, %v1281_v47, 0.0 }
 0xc04   :  { %1286 = vadd.xlane.f32.xlu0 %v1285_v49 }
 0xc05   :  { %v1280_v51 = vadd.f32 %v1529_v30, %v1278_v48 }
 0xc07   :  { %v1282_v29 = vsel %vm33_vm0, %v1280_v51, 0.0 }
 0xc08   :  { %1283 = vadd.xlane.f32.xlu2 %v1282_v29 }
 0xc77   :  { %v1287_v50 = vpop.xlane.xlu0 %1286 }
 0xc78   :  { %v1289_v52 = vmul.f32 %v1287_v50, %v1599_v8 }
 0xc7a   :  { %v1291_v54 = vsub.f32 %v1281_v47, %v1289_v52 }
 0xc7b   :  { %v1284_v55 = vpop.xlane.xlu2 %1283 }
 0xc7c   :  { %v1288_v44 = vmul.f32 %v1284_v55, %v1599_v8  ;;  %v1293_v24 = vmul.f32 %v1291_v54, %v1291_v54 }
 0xc7e   :  { %v1290_v56 = vsub.f32 %v1280_v51, %v1288_v44  ;;  %v1297_v57 = vsel %vm33_vm0, %v1293_v24, 0.0 }
 0xc7f   :  { %1298 = vadd.xlane.f32.xlu2 %v1297_v57 }
 0xc80   :  { %v1292_v53 = vmul.f32 %v1290_v56, %v1290_v56 }
 0xc82   :  { %v1294_v58 = vsel %vm33_vm0, %v1292_v53, 0.0 }
 0xc83   :  { %1295 = vadd.xlane.f32.xlu1 %v1294_v58 }
 0xcf2   :  { %v1299_v59 = vpop.xlane.xlu2 %1298 }
 0xcf3   :  { %v1301_v60 = vmul.f32 %v1299_v59, %v1599_v8 }
 0xcf5   :  { %v1303_v61 = vadd.f32 1e-05, %v1301_v60 }
 0xcf6   :  { %v1296_v62 = vpop.xlane.xlu1 %1295 }
 0xcf7   :  { %1525 = vrsqrt.f32 %v1303_v61  ;;  %v1300_v63 = vmul.f32 %v1296_v62, %v1599_v8  ;;  %vm1320_vm13 = vweird.f32 %v1303_v61 }
 0xcf9   :  { %v1302_v0 = vadd.f32 1e-05, %v1300_v63 }
 0xcfb   :  { %1527 = vrsqrt.f32 %v1302_v0  ;;  %vm1310_vm1 = vweird.f32 %v1302_v0 }
 0xcfd   :  { %v1526_v1 = vpop.eup %1525 }
 0xcfe   :  { %v1315_v18 = vmul.f32 %v1526_v1, %v1303_v61  ;;  %vm1321_vm5 = vweird.f32 %v1526_v1 }
 0xcff   :  { %vm1322_vm14 = vmor %vm1320_vm13, %vm1321_vm5 }
 0xd00   :  { %v1316_v19 = vmul.f32 %v1526_v1, %v1315_v18 }
 0xd01   :  { %v1528_v2 = vpop.eup %1527 }
 0xd02   :  { %v1317_v3 = vmul.f32 0.5, %v1316_v19  ;;  %v1305_v5 = vmul.f32 %v1528_v2, %v1302_v0  ;;  %vm1311_vm15 = vweird.f32 %v1528_v2 }
 0xd03   :  { %vm1312_vm2 = vmor %vm1310_vm1, %vm1311_vm15 }
 0xd04   :  { %v1318_v6 = vsub.f32 1.5, %v1317_v3  ;;  %v1306_v7 = vmul.f32 %v1528_v2, %v1305_v5 }
 0xd06   :  { %v1319_v9 = vmul.f32 %v1526_v1, %v1318_v6  ;;  %v1307_v10 = vmul.f32 0.5, %v1306_v7 }
 0xd08   :  { %v1323_v8 = vsel %vm1322_vm14, %v1526_v1, %v1319_v9  ;;  %v1308_v12 = vsub.f32 1.5, %v1307_v10 }
 0xd09   :  { %v1325_v13 = vmul.f32 %v1323_v8, %v1291_v54 }
 0xd0a   :  { %v1309_v15 = vmul.f32 %v1528_v2, %v1308_v12 }
 0xd0b   :  { %v1328_v16 = vmul.f32 %v1485_v11, %v1325_v13 }
 0xd0c   :  { %v1313_v17 = vsel %vm1312_vm2, %v1528_v2, %v1309_v15 }
 0xd0d   :  { %v1324_v20 = vmul.f32 %v1313_v17, %v1290_v56  ;;  %v1331_v21 = vadd.f32 %v1486_v14, %v1328_v16 }
 0xd0f   :  { %v1327_v22 = vmul.f32 %v1485_v11, %v1324_v20  ;;  %1333 = vst.msk [vmem:[#allocation2 + $0x8] sm:$0xff] %vm33_vm0, %v1331_v21 }
 0xd11   :  { %v1330_v23 = vadd.f32 %v1486_v14, %v1327_v22 }
 0xd13   :  { %1332 = vst.msk [vmem:[#allocation2] sm:$0xff] %vm33_vm0, %v1330_v23 }
 0xd14   :  { %1346 = dma.vmem_to_hbm [thread:$0]  %s1339_s17, 256, %s1341_s19, [#allocation3], %s1558_s5, %s1558_s5, %s1559_s20  }
 0xd15   :  { %1554 = dma.done.wait [#allocation3], 256  }
 0xd16   :  { %1555 = vsyncadd [#allocation3], 4294967040 }
 0xd17   :  { %1351 = vsyncpa [#allocation3], 1 }

</bundles_post_ra>
